<compile_context>
chip_gen: v7x
topology: tpu7x:2x2x1
jax: 0.10.0
libtpu: 0.0.40
codegen_flags: <defaults>
</compile_context>

<pallas_src>
import functools

import jax
import jax.numpy as jnp
from jax.experimental import pallas as pl
from jax.experimental.pallas import tpu as pltpu

_EPS = 1e-5


def _round_up(x, m):
    return (x + m - 1) // m * m


def _vmem_limit_bytes():
    # Generation-aware VMEM budget (v7x only has 64 MiB per TensorCore).
    try:
        cap = int(pltpu.get_tpu_info().vmem_capacity_bytes)
        return min(cap * 3 // 4, 96 * 1024 * 1024)
    except Exception:
        return 48 * 1024 * 1024


_VMEM_LIMIT = _vmem_limit_bytes()


def _cp(*dimension_semantics):
    return pltpu.CompilerParams(dimension_semantics=dimension_semantics,
                                vmem_limit_bytes=_VMEM_LIMIT)


def _pick_tile(m, candidates):
    for c in candidates:
        if m % c == 0:
            return c
    return m  # full-extent block (allowed even when not a multiple of 8)


# ---------------------------------------------------------------------------
# Tiled matmul (bf16 inputs, f32 accumulation) with optional fused bias and
# fused BatchNorm partial statistics (per-tile column sum / sum-of-squares).
# ---------------------------------------------------------------------------
def _make_mm_kernel(has_bias, emit_stats):
    def kernel(*args):
        idx = 0
        a_ref = args[idx]; idx += 1
        b_ref = args[idx]; idx += 1
        bias_ref = None
        if has_bias:
            bias_ref = args[idx]; idx += 1
        o_ref = args[idx]; idx += 1
        s_ref = q_ref = None
        if emit_stats:
            s_ref = args[idx]; q_ref = args[idx + 1]; idx += 2
        acc_ref = args[idx]

        @pl.when(pl.program_id(2) == 0)
        def _init():
            acc_ref[...] = jnp.zeros_like(acc_ref)

        acc_ref[...] += jnp.dot(a_ref[...], b_ref[...],
                                preferred_element_type=jnp.float32)

        @pl.when(pl.program_id(2) == pl.num_programs(2) - 1)
        def _store():
            acc = acc_ref[...]
            if has_bias:
                acc = acc + bias_ref[...]
            o_ref[...] = acc.astype(o_ref.dtype)
            if emit_stats:
                s_ref[0] = jnp.sum(acc, axis=0, keepdims=True)
                q_ref[0] = jnp.sum(acc * acc, axis=0, keepdims=True)

    return kernel


_MM_KERNELS = {(hb, es): _make_mm_kernel(hb, es)
               for hb in (False, True) for es in (False, True)}


def pallas_matmul(a, b, bias=None, emit_stats=False, out_dtype=jnp.bfloat16):
    """(M,K)@(K,N) [+bias]; optionally also returns column sum / sumsq partials."""
    M, K = a.shape
    assert b.shape[0] == K
    N = b.shape[1]

    # N padding / lane tile.
    if N % 128 == 0:
        Np = N
    elif N == 64:
        Np = 64
    elif N < 64:
        Np = _round_up(N, 8)
    else:
        Np = _round_up(N, 128)
    if Np % 256 == 0:
        tn = 256
    elif Np % 128 == 0:
        tn = 128
    else:
        tn = Np

    # M tile: divisor of M -> no zero-pad pass of the activation.
    tm = _pick_tile(M, (512, 256, 128, 64, 32, 16, 8))

    # K: keep untiled for the sizes occurring in this network.
    Kp = _round_up(K, 8)
    if Kp <= 2304:
        tk = Kp
    elif Kp % 512 == 0:
        tk = 512
    elif Kp % 256 == 0:
        tk = 256
    elif Kp % 128 == 0:
        tk = 128
    else:
        tk = Kp

    a = a.astype(jnp.bfloat16)
    b = b.astype(jnp.bfloat16)
    if Kp != K:
        a = jnp.pad(a, ((0, 0), (0, Kp - K)))
    if (Kp, Np) != (K, N):
        b = jnp.pad(b, ((0, Kp - K), (0, Np - N)))

    Gm, Gn, Gk = M // tm, Np // tn, Kp // tk
    has_bias = bias is not None

    in_specs = [pl.BlockSpec((tm, tk), lambda i, j, k: (i, k)),
                pl.BlockSpec((tk, tn), lambda i, j, k: (k, j))]
    args = [a, b]
    if has_bias:
        bias = bias.reshape(1, N).astype(jnp.float32)
        if Np != N:
            bias = jnp.pad(bias, ((0, 0), (0, Np - N)))
        in_specs.append(pl.BlockSpec((1, tn), lambda i, j, k: (0, j)))
        args.append(bias)

    out_shapes = [jax.ShapeDtypeStruct((M, Np), out_dtype)]
    out_specs = [pl.BlockSpec((tm, tn), lambda i, j, k: (i, j))]
    if emit_stats:
        out_shapes += [jax.ShapeDtypeStruct((Gm, 1, Np), jnp.float32)] * 2
        out_specs += [pl.BlockSpec((1, 1, tn), lambda i, j, k: (i, 0, j))] * 2

    res = pl.pallas_call(
        _MM_KERNELS[(has_bias, emit_stats)],
        out_shape=tuple(out_shapes),
        grid=(Gm, Gn, Gk),
        in_specs=in_specs,
        out_specs=tuple(out_specs),
        scratch_shapes=[pltpu.VMEM((tm, tn), jnp.float32)],
        compiler_params=_cp("parallel", "parallel", "arbitrary"),
    )(*args)

    y = res[0]
    if Np != N:
        y = y[:, :N]
    if not emit_stats:
        return y
    ssum = jnp.sum(res[1], axis=(0, 1))[:N]
    ssq = jnp.sum(res[2], axis=(0, 1))[:N]
    return y, ssum, ssq


# ---------------------------------------------------------------------------
# Dual-operand matmul: y = a1 @ b1 + a2 @ b2  (== concat 1x1 conv, no concat
# tensor in HBM).  Uses a f32 VMEM accumulator and emits BN partials.
# ---------------------------------------------------------------------------
def _dual_mm_kernel(a1_ref, b1_ref, a2_ref, b2_ref, o_ref, s_ref, q_ref, acc_ref):
    acc_ref[...] = jnp.dot(a1_ref[...], b1_ref[...],
                           preferred_element_type=jnp.float32)
    acc_ref[...] += jnp.dot(a2_ref[...], b2_ref[...],
                            preferred_element_type=jnp.float32)
    acc = acc_ref[...]
    o_ref[...] = acc.astype(o_ref.dtype)
    s_ref[0] = jnp.sum(acc, axis=0, keepdims=True)
    q_ref[0] = jnp.sum(acc * acc, axis=0, keepdims=True)


def pallas_dual_matmul(a1, b1, a2, b2, out_dtype=jnp.bfloat16):
    M, K1 = a1.shape
    K2 = a2.shape[1]
    N = b1.shape[1]
    tn = 128 if N % 128 == 0 else N
    tm = _pick_tile(M, (256, 128, 64, 32, 16, 8))
    Gm, Gn = M // tm, N // tn

    a1 = a1.astype(jnp.bfloat16)
    a2 = a2.astype(jnp.bfloat16)
    b1 = b1.astype(jnp.bfloat16)
    b2 = b2.astype(jnp.bfloat16)

    y, ssum, ssq = pl.pallas_call(
        _dual_mm_kernel,
        out_shape=(jax.ShapeDtypeStruct((M, N), out_dtype),
                   jax.ShapeDtypeStruct((Gm, 1, N), jnp.float32),
                   jax.ShapeDtypeStruct((Gm, 1, N), jnp.float32)),
        grid=(Gm, Gn),
        in_specs=[pl.BlockSpec((tm, K1), lambda i, j: (i, 0)),
                  pl.BlockSpec((K1, tn), lambda i, j: (0, j)),
                  pl.BlockSpec((tm, K2), lambda i, j: (i, 0)),
                  pl.BlockSpec((K2, tn), lambda i, j: (0, j))],
        out_specs=(pl.BlockSpec((tm, tn), lambda i, j: (i, j)),
                   pl.BlockSpec((1, 1, tn), lambda i, j: (i, 0, j)),
                   pl.BlockSpec((1, 1, tn), lambda i, j: (i, 0, j))),
        scratch_shapes=[pltpu.VMEM((tm, tn), jnp.float32)],
        compiler_params=_cp("parallel", "parallel"),
    )(a1, b1, a2, b2)
    return y, jnp.sum(ssum, axis=(0, 1)), jnp.sum(ssq, axis=(0, 1))


# ---------------------------------------------------------------------------
# Direct 3x3 conv (stride 1), row-tiled with a haloed, double-buffered window
# DMA from HBM.  Flat trick: for the padded image flattened to rows of width
# Wp = W+2, the tap (di,dj) contribution for flat index q reads q + di*Wp + dj,
# so each tap is a contiguous window -> plain 2-D matmuls.  The kernel stores
# W-dense rows (no XLA crop) and emits BN sum/sumsq partials.
# ---------------------------------------------------------------------------
def _conv3x3_direct_kernel(x_hbm, w_ref, y_ref, ssum_ref, ssq_ref,
                           xbuf, acc_ref, sem, *, th, W, Wp, Lp):
    n = pl.program_id(0)
    r = pl.program_id(2)
    R = pl.num_programs(2)
    L_out = th * Wp
    L_in = (th + 3) * Wp
    slot = r % 2

    def issue(row_tile, s):
        pltpu.make_async_copy(
            x_hbm.at[pl.ds(n * Lp + row_tile * L_out, L_in), :],
            xbuf.at[s], sem.at[s]).start()

    @pl.when(r == 0)
    def _prime():
        issue(0, 0)

    pltpu.make_async_copy(x_hbm.at[pl.ds(0, L_in), :],
                          xbuf.at[slot], sem.at[slot]).wait()

    @pl.when(r + 1 < R)
    def _prefetch():
        issue(r + 1, 1 - slot)

    # 9 taps; tap 0 initializes the accumulator (no zero-init pass).
    acc_ref[...] = jnp.dot(xbuf[slot, 0:L_out, :], w_ref[0],
                           preferred_element_type=jnp.float32)
    for t in range(1, 9):
        di, dj = divmod(t, 3)
        off = di * Wp + dj
        acc_ref[...] += jnp.dot(xbuf[slot, off:off + L_out, :], w_ref[t],
                                preferred_element_type=jnp.float32)

    # Store W-dense rows and accumulate BN partials over valid columns only.
    s_acc = None
    q_acc = None
    for rr in range(th):
        row = acc_ref[rr * Wp: rr * Wp + W, :]
        y_ref[0, rr] = row.astype(y_ref.dtype)
        rs = jnp.sum(row, axis=0, keepdims=True)
        rq = jnp.sum(row * row, axis=0, keepdims=True)
        s_acc = rs if s_acc is None else s_acc + rs
        q_acc = rq if q_acc is None else q_acc + rq
    ssum_ref[0, 0] = s_acc
    ssq_ref[0, 0] = q_acc


def _plan_direct_conv(H, W, Cin, Co):
    """Pick (th, tn, Co_p) so the kernel fits the VMEM budget; None -> fallback."""
    Co_p = Co if Co % 8 == 0 else _round_up(Co, 8)
    if Co_p % 256 == 0:
        tn = 256
    elif Co_p % 128 == 0:
        tn = 128
    else:
        tn = Co_p
    Wp = W + 2
    budget = int(_VMEM_LIMIT * 0.6)

    def lane(c):  # VMEM lane padding (sub-128 lane dims occupy a full 128 lanes)
        return _round_up(max(c, 128), 128)

    for th in range(min(H, 32), 0, -1):
        if H % th:
            continue
        L_in = (th + 3) * Wp
        L_out = th * Wp
        need = (2 * L_in * lane(Cin) * 2          # haloed window, double buffered
                + L_out * lane(tn) * 4            # f32 accumulator
                + 2 * 9 * Cin * lane(tn) * 2      # weight block, double buffered
                + 2 * th * _round_up(W, 8) * lane(tn) * 2)  # output block x2
        if need <= budget:
            return th, tn, Co_p
    return None


def _conv3x3_direct(x, w, th, tn, Co_p):
    N, H, W, Cin = x.shape
    Co = w.shape[-1]
    Wp = W + 2
    R = H // th
    J = Co_p // tn
    L_in = (th + 3) * Wp
    L_out = th * Wp
    Lp = (H + 3) * Wp

    xp = jnp.pad(x.astype(jnp.bfloat16), ((0, 0), (1, 2), (1, 1), (0, 0)))
    xf = xp.reshape(N * Lp, Cin)
    wf = w.astype(jnp.bfloat16).reshape(9, Cin, Co)
    if Co_p != Co:
        wf = jnp.pad(wf, ((0, 0), (0, 0), (0, Co_p - Co)))

    kernel = functools.partial(_conv3x3_direct_kernel, th=th, W=W, Wp=Wp, Lp=Lp)
    y, ssum, ssq = pl.pallas_call(
        kernel,
        out_shape=(jax.ShapeDtypeStruct((N, H, W, Co_p), jnp.bfloat16),
                   jax.ShapeDtypeStruct((N, R, 1, Co_p), jnp.float32),
                   jax.ShapeDtypeStruct((N, R, 1, Co_p), jnp.float32)),
        grid=(N, J, R),
        in_specs=[pl.BlockSpec(memory_space=pl.ANY),
                  pl.BlockSpec((9, Cin, tn), lambda n, j, r: (0, 0, j))],
        out_specs=(pl.BlockSpec((1, th, W, tn), lambda n, j, r: (n, r, 0, j)),
                   pl.BlockSpec((1, 1, 1, tn), lambda n, j, r: (n, r, 0, j)),
                   pl.BlockSpec((1, 1, 1, tn), lambda n, j, r: (n, r, 0, j))),
        scratch_shapes=[pltpu.VMEM((2, L_in, Cin), jnp.bfloat16),
                        pltpu.VMEM((L_out, tn), jnp.float32),
                        pltpu.SemaphoreType.DMA((2,))],
        compiler_params=_cp("parallel", "parallel", "arbitrary"),
    )(xf, wf)

    ssum = jnp.sum(ssum, axis=(0, 1, 2))
    ssq = jnp.sum(ssq, axis=(0, 1, 2))
    if Co_p != Co:
        y = y[..., :Co]
        ssum = ssum[:Co]
        ssq = ssq[:Co]
    return y, ssum, ssq, N * H * W


# ---------------------------------------------------------------------------
# Convolution wrappers (all return (y, bn_sum, bn_sumsq, count))
# ---------------------------------------------------------------------------
def _im2col3x3(x, stride):
    N, H, W, C = x.shape
    xp = jnp.pad(x, ((0, 0), (1, 1), (1, 1), (0, 0)))
    Ho = (H + 2 - 3) // stride + 1
    Wo = (W + 2 - 3) // stride + 1
    cols = []
    for i in range(3):
        for j in range(3):
            cols.append(xp[:, i:i + stride * Ho:stride, j:j + stride * Wo:stride, :])
    patches = jnp.stack(cols, axis=3)                # (N, Ho, Wo, 9, C)
    return patches.reshape(N * Ho * Wo, 9 * C), Ho, Wo


def conv3x3_stats(x, w, stride=1):
    """3x3 conv, padding=1, no bias.  w: (3, 3, Cin, Cout)."""
    N, H, W, Cin = x.shape
    Co = w.shape[-1]
    if stride == 1 and Cin % 8 == 0 and Cin >= 32:
        plan = _plan_direct_conv(H, W, Cin, Co)
        if plan is not None:
            th, tn, Co_p = plan
            return _conv3x3_direct(x, w, th, tn, Co_p)
    # Fallback: im2col + tiled matmul (stride-2 convs and tiny-Cin layers, where
    # folding the 9 taps into K fills the MXU much better than K=Cin dots).
    # TODO(synk): replace the stride-2 im2col with a direct strided-tap kernel.
    if Cin % 8:
        pad_c = _round_up(Cin, 8) - Cin
        x = jnp.pad(x, ((0, 0), (0, 0), (0, 0), (0, pad_c)))
        w = jnp.pad(w, ((0, 0), (0, 0), (0, pad_c), (0, 0)))
    patches, Ho, Wo = _im2col3x3(x.astype(jnp.bfloat16), stride)
    y, ssum, ssq = pallas_matmul(patches, w.reshape(-1, Co), emit_stats=True)
    return y.reshape(N, Ho, Wo, Co), ssum, ssq, N * Ho * Wo


def conv1x1_stats(x, w, stride=1):
    """1x1 conv, no bias.  w: (Cin, Cout)."""
    if stride > 1:
        x = x[:, ::stride, ::stride, :]
    N, H, W, C = x.shape
    Co = w.shape[-1]
    y, ssum, ssq = pallas_matmul(x.reshape(-1, C), w, emit_stats=True)
    return y.reshape(N, H, W, Co), ssum, ssq, N * H * W


def conv1x1_concat_stats(xa, xb, w):
    """1x1 conv of channel-concat([xa, xb]) without materializing the concat."""
    N, H, W, Ca = xa.shape
    Cb = xb.shape[-1]
    Co = w.shape[-1]
    y, ssum, ssq = pallas_dual_matmul(xa.reshape(-1, Ca), w[:Ca],
                                      xb.reshape(-1, Cb), w[Ca:])
    return y.reshape(N, H, W, Co), ssum, ssq, N * H * W


def conv_transpose2x2_s2(x, w, b):
    """ConvTranspose2d(k=2, stride=2).  w: (Cin, 2, 2, Cout), b: (Cout,)."""
    N, H, W, C = x.shape
    Co = w.shape[-1]
    wm = w.reshape(C, 4 * Co)
    bias = jnp.tile(b, 4).reshape(1, 4 * Co)
    y = pallas_matmul(x.reshape(-1, C), wm, bias=bias)
    # TODO(synk): fuse the 2x2 pixel interleave into the matmul epilogue (strided
    # stores with Co kept on lanes) instead of this XLA transpose pass.
    y = y.reshape(N, H, W, 2, 2, Co).transpose(0, 1, 3, 2, 4, 5)
    return y.reshape(N, 2 * H, 2 * W, Co)


# ---------------------------------------------------------------------------
# BatchNorm apply (stats come fused from the producing conv kernel)
# ---------------------------------------------------------------------------
def _make_bn_apply_kernel(relu, residual):
    if residual:
        def kernel(x_ref, s_ref, t_ref, r_ref, o_ref):
            y = x_ref[...].astype(jnp.float32) * s_ref[...] + t_ref[...]
            y = y + r_ref[...].astype(jnp.float32)
            if relu:
                y = jnp.maximum(y, 0.0)
            o_ref[...] = y.astype(o_ref.dtype)
    else:
        def kernel(x_ref, s_ref, t_ref, o_ref):
            y = x_ref[...].astype(jnp.float32) * s_ref[...] + t_ref[...]
            if relu:
                y = jnp.maximum(y, 0.0)
            o_ref[...] = y.astype(o_ref.dtype)
    return kernel


_BN_APPLY = {(relu, res): _make_bn_apply_kernel(relu, res)
             for relu in (False, True) for res in (False, True)}


def bn_apply_stats(x, ssum, ssq, count, gamma, beta, residual=None, relu=False):
    """BatchNorm2d (batch stats, eps=1e-5) + optional residual add + ReLU."""
    shape = x.shape
    C = shape[-1]
    xf = x.reshape(-1, C)
    M = xf.shape[0]

    mean = ssum / count
    var = jnp.maximum(ssq / count - mean * mean, 0.0)
    scale_v = gamma * jax.lax.rsqrt(var + _EPS)
    shift_v = beta - mean * scale_v
    scale = scale_v.astype(jnp.float32).reshape(1, C)
    shift = shift_v.astype(jnp.float32).reshape(1, C)

    tm = _pick_tile(M, (512, 256, 128, 64, 32, 16, 8))
    G = M // tm
    has_res = residual is not None
    kernel = _BN_APPLY[(bool(relu), has_res)]

    in_specs = [pl.BlockSpec((tm, C), lambda i: (i, 0)),
                pl.BlockSpec((1, C), lambda i: (0, 0)),
                pl.BlockSpec((1, C), lambda i: (0, 0))]
    args = [xf, scale, shift]
    if has_res:
        in_specs.append(pl.BlockSpec((tm, C), lambda i: (i, 0)))
        args.append(residual.reshape(-1, C).astype(jnp.bfloat16))

    out = pl.pallas_call(
        kernel,
        out_shape=jax.ShapeDtypeStruct((M, C), jnp.bfloat16),
        grid=(G,),
        in_specs=in_specs,
        out_specs=pl.BlockSpec((tm, C), lambda i: (i, 0)),
        compiler_params=_cp("parallel"),
    )(*args)
    return out.reshape(shape)


# Fused conv + BN (+residual, +ReLU) helpers ---------------------------------
def conv3x3_bn(x, w, gamma, beta, stride=1, residual=None, relu=True):
    y, ssum, ssq, cnt = conv3x3_stats(x, w, stride)
    return bn_apply_stats(y, ssum, ssq, cnt, gamma, beta, residual, relu)


def conv1x1_bn(x, w, gamma, beta, stride=1, residual=None, relu=False):
    y, ssum, ssq, cnt = conv1x1_stats(x, w, stride)
    return bn_apply_stats(y, ssum, ssq, cnt, gamma, beta, residual, relu)


def conv1x1_concat_bn(xa, xb, w, gamma, beta, relu=False):
    y, ssum, ssq, cnt = conv1x1_concat_stats(xa, xb, w)
    return bn_apply_stats(y, ssum, ssq, cnt, gamma, beta, None, relu)


# ---------------------------------------------------------------------------
# Parameter init (deterministic, synthetic)
# ---------------------------------------------------------------------------
def _init_conv3(key, cin, cout):
    std = (2.0 / (cout * 9)) ** 0.5   # kaiming_normal fan_out, relu
    return (jax.random.normal(key, (3, 3, cin, cout)) * std).astype(jnp.float32)


def _init_conv1(key, cin, cout):
    std = (2.0 / cout) ** 0.5
    return (jax.random.normal(key, (cin, cout)) * std).astype(jnp.float32)


def _init_bn(c):
    return jnp.ones((c,), jnp.float32), jnp.zeros((c,), jnp.float32)


def _init_convT(key, cin, cout):
    k1, k2 = jax.random.split(key)
    bound = 1.0 / ((cin * 4) ** 0.5)
    w = jax.random.uniform(k1, (cin, 2, 2, cout), jnp.float32, -bound, bound)
    b = jax.random.uniform(k2, (cout,), jnp.float32, -bound, bound)
    return w, b


def _init_conv_module(key, cin, cout):  # class Conv
    k1, k2 = jax.random.split(key)
    g1, b1 = _init_bn(cout)
    g2, b2 = _init_bn(cout)
    return dict(w1=_init_conv3(k1, cin, cout), g1=g1, b1=b1,
                w2=_init_conv3(k2, cout, cout), g2=g2, b2=b2)


def _init_basic_block(key, inplanes, planes, stride, downsample):
    k1, k2, k3 = jax.random.split(key, 3)
    g1, b1 = _init_bn(planes)
    g2, b2 = _init_bn(planes)
    p = dict(w1=_init_conv3(k1, inplanes, planes), g1=g1, b1=b1,
             w2=_init_conv3(k2, planes, planes), g2=g2, b2=b2,
             stride=stride, downsample=downsample)
    if downsample:
        gd, bd = _init_bn(planes)
        p.update(wd=_init_conv1(k3, inplanes, planes), gd=gd, bd=bd)
    return p


def _init_upsample(key, inplanes, planes):
    if inplanes // planes == 2:
        c3_in = inplanes
    elif inplanes == planes:
        c3_in = inplanes * 2
    else:
        c3_in = inplanes // 2
    k0, k1, k2, k3 = jax.random.split(key, 4)
    wt, bt = _init_convT(k0, inplanes, planes)
    g1, b1 = _init_bn(planes)
    g2, b2 = _init_bn(planes)
    g3, b3 = _init_bn(planes)
    return dict(wt=wt, bt=bt,
                w1=_init_conv3(k1, planes, planes), g1=g1, b1=b1,
                w2=_init_conv3(k2, planes, planes), g2=g2, b2=b2,
                w3=_init_conv1(k3, c3_in, planes), g3=g3, b3=b3)


def init_unet(key, layers=(1, 1, 1, 1), classes=3):
    ks = iter(jax.random.split(key, 32))
    params = {'conv_begin': _init_conv_module(next(ks), 3, 64)}
    inplanes = 64
    for idx, (planes, blocks) in enumerate(zip((64, 128, 256, 512), layers), 1):
        blist = []
        for bi in range(blocks):
            s = 2 if bi == 0 else 1
            ds = (s != 1) or (inplanes != planes)
            blist.append(_init_basic_block(next(ks), inplanes, planes, s, ds))
            inplanes = planes
        params[f'layer{idx}'] = blist
    params['up1'] = _init_upsample(next(ks), 512, 256)
    params['up2'] = _init_upsample(next(ks), 256, 128)
    params['up3'] = _init_upsample(next(ks), 128, 64)
    params['up4'] = _init_upsample(next(ks), 64, 64)
    params['conv_end'] = _init_conv_module(next(ks), 64, classes)
    return params


# ---------------------------------------------------------------------------
# Module forwards
# ---------------------------------------------------------------------------
def conv_module_fwd(p, x):  # class Conv: conv-bn-relu x2
    x = conv3x3_bn(x, p['w1'], p['g1'], p['b1'], relu=True)
    x = conv3x3_bn(x, p['w2'], p['g2'], p['b2'], relu=True)
    return x


def basic_block_fwd(p, x):
    identity = x
    out = conv3x3_bn(x, p['w1'], p['g1'], p['b1'], stride=p['stride'], relu=True)
    if p['downsample']:
        identity = conv1x1_bn(x, p['wd'], p['gd'], p['bd'],
                              stride=p['stride'], relu=False)
    out = conv3x3_bn(out, p['w2'], p['g2'], p['b2'],
                     residual=identity, relu=True)
    return out


def layer_fwd(blocks, x):
    for b in blocks:
        x = basic_block_fwd(b, x)
    return x


def upsample_fwd(p, x1, x2):
    x1 = conv_transpose2x2_s2(x1, p['wt'], p['bt'])
    diffY = x2.shape[1] - x1.shape[1]
    diffX = x2.shape[2] - x1.shape[2]
    if diffY or diffX:
        x1 = jnp.pad(x1, ((0, 0),
                          (diffY // 2, diffY - diffY // 2),
                          (diffX // 2, diffX - diffX // 2),
                          (0, 0)))
    # concat([x2, x1], channel) -> 1x1 conv + bn3, without materializing the concat.
    x = conv1x1_concat_bn(x2, x1, p['w3'], p['g3'], p['b3'], relu=False)
    identity = x
    out = conv3x3_bn(x, p['w1'], p['g1'], p['b1'], relu=True)
    out = conv3x3_bn(out, p['w2'], p['g2'], p['b2'], residual=identity, relu=True)
    return out


def unet_forward(params, x_nchw):
    x = jnp.transpose(x_nchw, (0, 2, 3, 1)).astype(jnp.bfloat16)  # NCHW -> NHWC
    x = conv_module_fwd(params['conv_begin'], x)
    d1 = layer_fwd(params['layer1'], x)
    d2 = layer_fwd(params['layer2'], d1)
    d3 = layer_fwd(params['layer3'], d2)
    d4 = layer_fwd(params['layer4'], d3)
    u1 = upsample_fwd(params['up1'], d4, d3)
    u2 = upsample_fwd(params['up2'], u1, d2)
    u3 = upsample_fwd(params['up3'], u2, d1)
    u4 = upsample_fwd(params['up4'], u3, x)
    out = conv_module_fwd(params['conv_end'], u4)
    return jnp.transpose(out, (0, 3, 1, 2)).astype(jnp.float32)  # NHWC -> NCHW


# ---------------------------------------------------------------------------
if __name__ == "__main__":
    key = jax.random.PRNGKey(0)
    pkey, xkey = jax.random.split(key)
    params = init_unet(pkey, layers=(1, 1, 1, 1), classes=3)
    x = jax.random.normal(xkey, (2, 3, 16, 16), jnp.float32)  # NCHW like PyTorch
    out = unet_forward(params, x)
    out = jax.block_until_ready(out)
    assert out.shape == (2, 3, 16, 16), out.shape
    assert jnp.all(jnp.isfinite(out))
    print("KERNEL_OK")
</pallas_src>

<mosaic_0001>
module attributes {stable_mosaic.version = 11 : i64} {
  func.func @kernel(%arg0: i32, %arg1: i32, %arg2: i32, %arg3: memref<512x72xbf16, #tpu.memory_space<vmem>>, %arg4: memref<72x64xbf16, #tpu.memory_space<vmem>>, %arg5: memref<512x64xbf16, #tpu.memory_space<vmem>>, %arg6: memref<1x1x64xf32, #tpu.memory_space<vmem>>, %arg7: memref<1x1x64xf32, #tpu.memory_space<vmem>>, %arg8: memref<512x64xf32, #tpu.memory_space<vmem>>) attributes {dimension_semantics = [#tpu.dimension_semantics<parallel>, #tpu.dimension_semantics<parallel>, #tpu.dimension_semantics<arbitrary>], iteration_bounds = array<i64: 1, 1, 1>, scalar_prefetch = 0 : i64, scratch_operands = 1 : i64, tpu.core_type = #tpu.core_type<tc>, window_params = [{transform_indices = @transform_0, window_bounds = array<i64: 512, 72>}, {transform_indices = @transform_1, window_bounds = array<i64: 72, 64>}, {transform_indices = @transform_2, window_bounds = array<i64: 512, 64>}, {transform_indices = @transform_3, window_bounds = array<i64: 1, 1, 64>}, {transform_indices = @transform_4, window_bounds = array<i64: 1, 1, 64>}]} {
    %c0_i32 = arith.constant 0 : i32
    %0 = arith.cmpi eq, %arg2, %c0_i32 : i32
    %1 = arith.extui %0 : i1 to i32
    %c0_i32_0 = arith.constant 0 : i32
    %2 = arith.cmpi ne, %1, %c0_i32_0 : i32
    scf.if %2 {
      %cst_10 = arith.constant 0.000000e+00 : f32
      %12 = vector.broadcast %cst_10 : f32 to vector<512x64xf32>
      %c0_11 = arith.constant 0 : index
      %c0_12 = arith.constant 0 : index
      %13 = vector.load %arg8[%c0_11, %c0_12] : memref<512x64xf32, #tpu.memory_space<vmem>>, vector<512x64xf32>
      tpu.vector_store %arg8[%c0_11, %c0_12], %12 {strides = array<i32>} : memref<512x64xf32, #tpu.memory_space<vmem>>, vector<512x64xf32>,
    } else {
    }
    %c0 = arith.constant 0 : index
    %c0_1 = arith.constant 0 : index
    %3 = vector.load %arg8[%c0, %c0_1] : memref<512x64xf32, #tpu.memory_space<vmem>>, vector<512x64xf32>
    %c0_2 = arith.constant 0 : index
    %c0_3 = arith.constant 0 : index
    %4 = vector.load %arg3[%c0_2, %c0_3] : memref<512x72xbf16, #tpu.memory_space<vmem>>, vector<512x72xbf16>
    %c0_4 = arith.constant 0 : index
    %c0_5 = arith.constant 0 : index
    %5 = vector.load %arg4[%c0_4, %c0_5] : memref<72x64xbf16, #tpu.memory_space<vmem>>, vector<72x64xbf16>
    %cst = arith.constant dense<0.000000e+00> : vector<512x64xf32>
    %6 = tpu.matmul %4, %5, %cst {dimension_numbers = #tpu.dot_dimension_numbers<[1], [0], [0], [1], [0, 0, 1, 1], [], []>} : vector<512x72xbf16>, vector<72x64xbf16>, vector<512x64xf32> -> vector<512x64xf32>
    %7 = arith.addf %3, %6 : vector<512x64xf32>
    %c0_6 = arith.constant 0 : index
    %c0_7 = arith.constant 0 : index
    %8 = vector.load %arg8[%c0_6, %c0_7] : memref<512x64xf32, #tpu.memory_space<vmem>>, vector<512x64xf32>
    tpu.vector_store %arg8[%c0_6, %c0_7], %7 {strides = array<i32>} : memref<512x64xf32, #tpu.memory_space<vmem>>, vector<512x64xf32>,
    %c0_i32_8 = arith.constant 0 : i32
    %9 = arith.cmpi eq, %arg2, %c0_i32_8 : i32
    %10 = arith.extui %9 : i1 to i32
    %c0_i32_9 = arith.constant 0 : i32
    %11 = arith.cmpi ne, %10, %c0_i32_9 : i32
    scf.if %11 {
      %c0_10 = arith.constant 0 : index
      %c0_11 = arith.constant 0 : index
      %12 = vector.load %arg8[%c0_10, %c0_11] : memref<512x64xf32, #tpu.memory_space<vmem>>, vector<512x64xf32>
      %13 = arith.truncf %12 : vector<512x64xf32> to vector<512x64xbf16>
      %c0_12 = arith.constant 0 : index
      %c0_13 = arith.constant 0 : index
      %14 = vector.load %arg5[%c0_12, %c0_13] : memref<512x64xbf16, #tpu.memory_space<vmem>>, vector<512x64xbf16>
      tpu.vector_store %arg5[%c0_12, %c0_13], %13 {strides = array<i32>} : memref<512x64xbf16, #tpu.memory_space<vmem>>, vector<512x64xbf16>,
      %cst_14 = arith.constant dense<0.000000e+00> : vector<64xf32>
      %15 = vector.multi_reduction <add>, %12, %cst_14 [0] : vector<512x64xf32> to vector<64xf32>
      %16 = vector.shape_cast %15 : vector<64xf32> to vector<1x64xf32>
      %c0_15 = arith.constant 0 : index
      %c0_16 = arith.constant 0 : index
      %c0_17 = arith.constant 0 : index
      %17 = vector.load %arg6[%c0_15, %c0_16, %c0_17] : memref<1x1x64xf32, #tpu.memory_space<vmem>>, vector<1x1x64xf32>
      %18 = vector.shape_cast %17 : vector<1x1x64xf32> to vector<1x64xf32>
      %19 = vector.shape_cast %16 : vector<1x64xf32> to vector<1x1x64xf32>
      tpu.vector_store %arg6[%c0_15, %c0_16, %c0_17], %19 {strides = array<i32>} : memref<1x1x64xf32, #tpu.memory_space<vmem>>, vector<1x1x64xf32>,
      %20 = arith.mulf %12, %12 : vector<512x64xf32>
      %cst_18 = arith.constant dense<0.000000e+00> : vector<64xf32>
      %21 = vector.multi_reduction <add>, %20, %cst_18 [0] : vector<512x64xf32> to vector<64xf32>
      %22 = vector.shape_cast %21 : vector<64xf32> to vector<1x64xf32>
      %c0_19 = arith.constant 0 : index
      %c0_20 = arith.constant 0 : index
      %c0_21 = arith.constant 0 : index
      %23 = vector.load %arg7[%c0_19, %c0_20, %c0_21] : memref<1x1x64xf32, #tpu.memory_space<vmem>>, vector<1x1x64xf32>
      %24 = vector.shape_cast %23 : vector<1x1x64xf32> to vector<1x64xf32>
      %25 = vector.shape_cast %22 : vector<1x64xf32> to vector<1x1x64xf32>
      tpu.vector_store %arg7[%c0_19, %c0_20, %c0_21], %25 {strides = array<i32>} : memref<1x1x64xf32, #tpu.memory_space<vmem>>, vector<1x1x64xf32>,
    } else {
    }
    return
  }
  func.func @transform_0(%arg0: i32, %arg1: i32, %arg2: i32) -> (i32, i32) {
    %c0_i32 = arith.constant 0 : i32
    return %arg0, %arg2 : i32, i32
  }
  func.func @transform_1(%arg0: i32, %arg1: i32, %arg2: i32) -> (i32, i32) {
    %c0_i32 = arith.constant 0 : i32
    return %arg2, %arg1 : i32, i32
  }
  func.func @transform_2(%arg0: i32, %arg1: i32, %arg2: i32) -> (i32, i32) {
    %c0_i32 = arith.constant 0 : i32
    return %arg0, %arg1 : i32, i32
  }
  func.func @transform_3(%arg0: i32, %arg1: i32, %arg2: i32) -> (i32, i32, i32) {
    %c0_i32 = arith.constant 0 : i32
    %c0_i32_0 = arith.constant 0 : i32
    return %arg0, %c0_i32, %arg1 : i32, i32, i32
  }
  func.func @transform_4(%arg0: i32, %arg1: i32, %arg2: i32) -> (i32, i32, i32) {
    %c0_i32 = arith.constant 0 : i32
    %c0_i32_0 = arith.constant 0 : i32
    return %arg0, %c0_i32, %arg1 : i32, i32, i32
  }
}

</mosaic_0001>

<bundles_post_ra>
// kernel: tpu_custom_call.1
= control target key start
LH: loop header
LB: loop body
LE: loop exit
PB: predicated region body
PF: predicated region fallthrough
CT: control target
= control target key end

     0   :  { %10 = vsyncpa [#allocation4], 0  ;;  %vm21_vm0 = vcmask 523264   ;;  %vm410_vm1 = vcmask 588800   ;;  %v2090_v3 = vmov 0.0   ;;  %vm507_vm2 = vcmask 1043456   ;;  %s3231_s0 = inlined_call_operand.vmem [shape: bf16[512,72], index: 0, kind: input, shape index: {}]   ;;  %s3232_s1 = inlined_call_operand.vmem [shape: bf16[72,64], index: 1, kind: input, shape index: {}]   ;;  %s3233_s2 = inlined_call_operand.vmem [shape: bf16[512,64], index: 2, kind: output, shape index: {0}]   ;;  %s3234_s3 = inlined_call_operand.hbm [shape: f32[1,1,64], index: 3, kind: output, shape index: {1}]   ;;  %s3235_s4 = inlined_call_operand.hbm [shape: f32[1,1,64], index: 4, kind: output, shape index: {2}]  }
   0x1   :  { %v2005_v0 = vld [vmem:[%s3232_s1] sm:$0xff]   ;;  %v2124_v1 = vld [vmem:[%s3232_s1 + $0x8] sm:$0xff]   ;;  %v2130_v2 = vld [vmem:[%s3232_s1 + $0x10] sm:$0xff]   ;;  %24 = vst.msk [vmem:[#allocation2 + $0x10] sm:$0xff] %vm21_vm0, %v2090_v3 }
   0x2   :  { %1916 = vmatprep.subr.bf16.mxu0 %v2005_v0  ;;  %1990 = vmatprep.subr.bf16.mxu1 %v2005_v0  ;;  %22 = vst.msk [vmem:[#allocation2] sm:$0xff] %vm21_vm0, %v2090_v3  ;;  %23 = vst.msk [vmem:[#allocation2 + $0x8] sm:$0xff] %vm21_vm0, %v2090_v3  ;;  %v2010_v4 = vld [vmem:[%s3231_s0] sm:$0xff]   ;;  %v2008_v5 = vld [vmem:[%s3232_s1 + $0x18] sm:$0xff]  }
   0x3   :  { %1917 = vmatpush3.bf16.msra.mxu0 %v2005_v0  ;;  %1995 = vmatpush3.bf16.msra.mxu1 %v2005_v0  ;;  %25 = vst.msk [vmem:[#allocation2 + $0x18] sm:$0xff] %vm21_vm0, %v2090_v3  ;;  %26 = vst.msk [vmem:[#allocation2 + $0x20] sm:$0xff] %vm21_vm0, %v2090_v3  ;;  %v2009_v6 = vld [vmem:[%s3232_s1 + $0x20] ss:$0 sps:$4 sm:$0xff]   ;;  %v2011_v8 = vld [vmem:[%s3231_s0 + $0x8] sm:$0xff]  }
   0x4   :  { %1918 = vmatprep.subr.bf16.mxu0 %v2124_v1  ;;  %1991 = vmatprep.subr.bf16.mxu1 %v2124_v1  ;;  %27 = vst.msk [vmem:[#allocation2 + $0x28] sm:$0xff] %vm21_vm0, %v2090_v3  ;;  %28 = vst.msk [vmem:[#allocation2 + $0x30] sm:$0xff] %vm21_vm0, %v2090_v3  ;;  %v509_v7 = vsel %vm507_vm2, %v2009_v6, 0  ;;  %v2012_v9 = vld [vmem:[%s3231_s0 + $0x10] sm:$0xff]   ;;  %v2026_v10 = vld [vmem:[%s3231_s0 + $0x80] sm:$0xff]  }
   0x5   :  { %29 = vst.msk [vmem:[#allocation2 + $0x38] sm:$0xff] %vm21_vm0, %v2090_v3  ;;  %30 = vst.msk [vmem:[#allocation2 + $0x40] sm:$0xff] %vm21_vm0, %v2090_v3  ;;  %1926 = vmatprep.mubr.msk.bf16.mxu0 %vm410_vm1, %v2010_v4  ;;  %v2027_v11 = vld [vmem:[%s3231_s0 + $0x88] sm:$0xff]   ;;  %1958 = vmatprep.mubr.msk.bf16.mxu1 %vm410_vm1, %v2026_v10  ;;  %v2028_v12 = vld [vmem:[%s3231_s0 + $0x90] sm:$0xff]  }
   0x6   :  { %31 = vst.msk [vmem:[#allocation2 + $0x48] sm:$0xff] %vm21_vm0, %v2090_v3  ;;  %32 = vst.msk [vmem:[#allocation2 + $0x50] sm:$0xff] %vm21_vm0, %v2090_v3  ;;  %v2013_v13 = vld [vmem:[%s3231_s0 + $0x18] sm:$0xff]   ;;  %v2014_v14 = vld [vmem:[%s3231_s0 + $0x20] sm:$0xff]  }
   0x7   :  { %33 = vst.msk [vmem:[#allocation2 + $0x58] sm:$0xff] %vm21_vm0, %v2090_v3  ;;  %34 = vst.msk [vmem:[#allocation2 + $0x60] sm:$0xff] %vm21_vm0, %v2090_v3  ;;  %1919 = vmatpush3.bf16.msra.mxu0 %v2124_v1  ;;  %1996 = vmatpush3.bf16.msra.mxu1 %v2124_v1  ;;  %v2029_v15 = vld [vmem:[%s3231_s0 + $0x98] sm:$0xff]   ;;  %v2030_v16 = vld [vmem:[%s3231_s0 + $0xa0] sm:$0xff]  }
   0x8   :  { %35 = vst.msk [vmem:[#allocation2 + $0x68] sm:$0xff] %vm21_vm0, %v2090_v3  ;;  %36 = vst.msk [vmem:[#allocation2 + $0x70] sm:$0xff] %vm21_vm0, %v2090_v3  ;;  %1920 = vmatprep.subr.bf16.mxu0 %v2130_v2  ;;  %1992 = vmatprep.subr.bf16.mxu1 %v2130_v2  ;;  %v2015_v17 = vld [vmem:[%s3231_s0 + $0x28] sm:$0xff]   ;;  %v2016_v18 = vld [vmem:[%s3231_s0 + $0x30] sm:$0xff]  }
   0x9   :  { %37 = vst.msk [vmem:[#allocation2 + $0x78] sm:$0xff] %vm21_vm0, %v2090_v3  ;;  %38 = vst.msk [vmem:[#allocation2 + $0x80] sm:$0xff] %vm21_vm0, %v2090_v3  ;;  %v2031_v19 = vld [vmem:[%s3231_s0 + $0xa8] sm:$0xff]   ;;  %v2032_v20 = vld [vmem:[%s3231_s0 + $0xb0] sm:$0xff]  }
   0xa   :  { %39 = vst.msk [vmem:[#allocation2 + $0x88] sm:$0xff] %vm21_vm0, %v2090_v3  ;;  %40 = vst.msk [vmem:[#allocation2 + $0x90] sm:$0xff] %vm21_vm0, %v2090_v3 }
   0xb   :  { %41 = vst.msk [vmem:[#allocation2 + $0x98] sm:$0xff] %vm21_vm0, %v2090_v3  ;;  %42 = vst.msk [vmem:[#allocation2 + $0xa0] sm:$0xff] %vm21_vm0, %v2090_v3  ;;  %1921 = vmatpush3.bf16.msra.mxu0 %v2130_v2  ;;  %1997 = vmatpush3.bf16.msra.mxu1 %v2130_v2 }
   0xc   :  { %43 = vst.msk [vmem:[#allocation2 + $0xa8] sm:$0xff] %vm21_vm0, %v2090_v3  ;;  %44 = vst.msk [vmem:[#allocation2 + $0xb0] sm:$0xff] %vm21_vm0, %v2090_v3  ;;  %1922 = vmatprep.subr.bf16.mxu0 %v2008_v5  ;;  %1993 = vmatprep.subr.bf16.mxu1 %v2008_v5 }
   0xd   :  { %45 = vst.msk [vmem:[#allocation2 + $0xb8] sm:$0xff] %vm21_vm0, %v2090_v3  ;;  %46 = vst.msk [vmem:[#allocation2 + $0xc0] sm:$0xff] %vm21_vm0, %v2090_v3 }
   0xe   :  { %47 = vst.msk [vmem:[#allocation2 + $0xc8] sm:$0xff] %vm21_vm0, %v2090_v3  ;;  %48 = vst.msk [vmem:[#allocation2 + $0xd0] sm:$0xff] %vm21_vm0, %v2090_v3 }
   0xf   :  { %49 = vst.msk [vmem:[#allocation2 + $0xd8] sm:$0xff] %vm21_vm0, %v2090_v3  ;;  %50 = vst.msk [vmem:[#allocation2 + $0xe0] sm:$0xff] %vm21_vm0, %v2090_v3  ;;  %1923 = vmatpush3.bf16.msra.mxu0 %v2008_v5  ;;  %1998 = vmatpush3.bf16.msra.mxu1 %v2008_v5 }
  0x10   :  { %51 = vst.msk [vmem:[#allocation2 + $0xe8] sm:$0xff] %vm21_vm0, %v2090_v3  ;;  %52 = vst.msk [vmem:[#allocation2 + $0xf0] sm:$0xff] %vm21_vm0, %v2090_v3  ;;  %2000 = vmatprep.subr.msk.bf16.mxu0 %vm507_vm2, %v2009_v6  ;;  %2001 = vmatprep.subr.msk.bf16.mxu1 %vm507_vm2, %v2009_v6 }
  0x11   :  { %53 = vst.msk [vmem:[#allocation2 + $0xf8] sm:$0xff] %vm21_vm0, %v2090_v3  ;;  %54 = vst.msk [vmem:[#allocation2 + $0x100] sm:$0xff] %vm21_vm0, %v2090_v3 }
  0x12   :  { %55 = vst.msk [vmem:[#allocation2 + $0x108] sm:$0xff] %vm21_vm0, %v2090_v3  ;;  %56 = vst.msk [vmem:[#allocation2 + $0x110] sm:$0xff] %vm21_vm0, %v2090_v3 }
  0x13   :  { %57 = vst.msk [vmem:[#allocation2 + $0x118] sm:$0xff] %vm21_vm0, %v2090_v3  ;;  %58 = vst.msk [vmem:[#allocation2 + $0x120] sm:$0xff] %vm21_vm0, %v2090_v3  ;;  %1925 = vmatpush3.bf16.msra.mxu0 %v509_v7  ;;  %1999 = vmatpush3.bf16.msra.mxu1 %v509_v7 }
  0x14   :  { %59 = vst.msk [vmem:[#allocation2 + $0x128] sm:$0xff] %vm21_vm0, %v2090_v3  ;;  %60 = vst.msk [vmem:[#allocation2 + $0x130] sm:$0xff] %vm21_vm0, %v2090_v3 }
  0x15   :  { %61 = vst.msk [vmem:[#allocation2 + $0x138] sm:$0xff] %vm21_vm0, %v2090_v3  ;;  %62 = vst.msk [vmem:[#allocation2 + $0x140] sm:$0xff] %vm21_vm0, %v2090_v3 }
  0x16   :  { %63 = vst.msk [vmem:[#allocation2 + $0x148] sm:$0xff] %vm21_vm0, %v2090_v3  ;;  %64 = vst.msk [vmem:[#allocation2 + $0x150] sm:$0xff] %vm21_vm0, %v2090_v3  ;;  %1927 = vmatmul.mubr.msk.bf16.vlgmr.msra.gmra.mrb[0].mxu0 %vm410_vm1, %v2011_v8  ;;  %1959 = vmatmul.mubr.msk.bf16.vlgmr.msra.gmra.mrb[0].mxu1 %vm410_vm1, %v2027_v11 }
  0x17   :  { %65 = vst.msk [vmem:[#allocation2 + $0x158] sm:$0xff] %vm21_vm0, %v2090_v3  ;;  %66 = vst.msk [vmem:[#allocation2 + $0x160] sm:$0xff] %vm21_vm0, %v2090_v3  ;;  %1930 = vmatprep.mubr.msk.bf16.mxu0 %vm410_vm1, %v2012_v9  ;;  %1962 = vmatprep.mubr.msk.bf16.mxu1 %vm410_vm1, %v2028_v12 }
  0x18   :  { %67 = vst.msk [vmem:[#allocation2 + $0x168] sm:$0xff] %vm21_vm0, %v2090_v3  ;;  %68 = vst.msk [vmem:[#allocation2 + $0x170] sm:$0xff] %vm21_vm0, %v2090_v3 }
  0x19   :  { %69 = vst.msk [vmem:[#allocation2 + $0x178] sm:$0xff] %vm21_vm0, %v2090_v3  ;;  %70 = vst.msk [vmem:[#allocation2 + $0x180] sm:$0xff] %vm21_vm0, %v2090_v3 }
  0x1a   :  { %71 = vst.msk [vmem:[#allocation2 + $0x188] sm:$0xff] %vm21_vm0, %v2090_v3  ;;  %72 = vst.msk [vmem:[#allocation2 + $0x190] sm:$0xff] %vm21_vm0, %v2090_v3 }
  0x1b   :  { %73 = vst.msk [vmem:[#allocation2 + $0x198] sm:$0xff] %vm21_vm0, %v2090_v3  ;;  %74 = vst.msk [vmem:[#allocation2 + $0x1a0] sm:$0xff] %vm21_vm0, %v2090_v3 }
  0x1c   :  { %75 = vst.msk [vmem:[#allocation2 + $0x1a8] sm:$0xff] %vm21_vm0, %v2090_v3  ;;  %76 = vst.msk [vmem:[#allocation2 + $0x1b0] sm:$0xff] %vm21_vm0, %v2090_v3 }
  0x1d   :  { %77 = vst.msk [vmem:[#allocation2 + $0x1b8] sm:$0xff] %vm21_vm0, %v2090_v3  ;;  %78 = vst.msk [vmem:[#allocation2 + $0x1c0] sm:$0xff] %vm21_vm0, %v2090_v3 }
  0x1e   :  { %79 = vst.msk [vmem:[#allocation2 + $0x1c8] sm:$0xff] %vm21_vm0, %v2090_v3  ;;  %80 = vst.msk [vmem:[#allocation2 + $0x1d0] sm:$0xff] %vm21_vm0, %v2090_v3  ;;  %1931 = vmatmul.mubr.msk.bf16.gmra.mrb[4].mxu0 %vm410_vm1, %v2013_v13  ;;  %1963 = vmatmul.mubr.msk.bf16.gmra.mrb[4].mxu1 %vm410_vm1, %v2029_v15 }
  0x1f   :  { %81 = vst.msk [vmem:[#allocation2 + $0x1d8] sm:$0xff] %vm21_vm0, %v2090_v3  ;;  %82 = vst.msk [vmem:[#allocation2 + $0x1e0] sm:$0xff] %vm21_vm0, %v2090_v3  ;;  %1934 = vmatprep.mubr.msk.bf16.mxu0 %vm410_vm1, %v2014_v14  ;;  %1966 = vmatprep.mubr.msk.bf16.mxu1 %vm410_vm1, %v2030_v16 }
  0x20   :  { %83 = vst.msk [vmem:[#allocation2 + $0x1e8] sm:$0xff] %vm21_vm0, %v2090_v3  ;;  %84 = vst.msk [vmem:[#allocation2 + $0x1f0] sm:$0xff] %vm21_vm0, %v2090_v3 }
  0x21   :  { %85 = vst.msk [vmem:[#allocation2 + $0x1f8] sm:$0xff] %vm21_vm0, %v2090_v3 }
  0x22   :  { %11 = vsyncpa [#allocation6], 0  ;;  %v2017_v21 = vld [vmem:[%s3231_s0 + $0x38] sm:$0xff]   ;;  %v2018_v22 = vld [vmem:[%s3231_s0 + $0x40] sm:$0xff]   ;;  %vm1252_vm3 = vcmask 519168   ;;  %vm1450_vm4 = vcmask 516096  }
  0x23   :  { %v2033_v23 = vld [vmem:[%s3231_s0 + $0xb8] sm:$0xff]   ;;  %v2034_v24 = vld [vmem:[%s3231_s0 + $0xc0] sm:$0xff]   ;;  %v2019_v25 = vld [vmem:[%s3231_s0 + $0x48] sm:$0xff]   ;;  %s2092_s24 = smov [#allocation5]  }
  0x24   :  { %v2020_v26 = vld [vmem:[%s3231_s0 + $0x50] sm:$0xff]   ;;  %v2035_v27 = vld [vmem:[%s3231_s0 + $0xc8] sm:$0xff]   ;;  %v2021_v29 = vld [vmem:[%s3231_s0 + $0x58] sm:$0xff]   ;;  %s1668_s25 = sshll.u32 %s2092_s24, 4  ;;  %s3198_s25 = int_to_ptr.vmem [resolvable:$true] %s1668_s25 }
  0x25   :  { %v2036_v28 = vld [vmem:[%s3231_s0 + $0xd0] sm:$0xff]   ;;  %v2022_v30 = vld [vmem:[%s3231_s0 + $0x60] sm:$0xff]   ;;  %v2037_v31 = vld [vmem:[%s3231_s0 + $0xd8] sm:$0xff]  }
  0x26   :  { %1935 = vmatmul.mubr.msk.bf16.gmra.mrb[8].mxu0 %vm410_vm1, %v2015_v17  ;;  %1967 = vmatmul.mubr.msk.bf16.gmra.mrb[8].mxu1 %vm410_vm1, %v2031_v19  ;;  %v2038_v32 = vld [vmem:[%s3231_s0 + $0xe0] sm:$0xff]   ;;  %v2023_v33 = vld [vmem:[%s3231_s0 + $0x68] sm:$0xff]   ;;  %v2024_v34 = vld [vmem:[%s3231_s0 + $0x70] sm:$0xff]  }
  0x27   :  { %1938 = vmatprep.mubr.msk.bf16.mxu0 %vm410_vm1, %v2016_v18  ;;  %1970 = vmatprep.mubr.msk.bf16.mxu1 %vm410_vm1, %v2032_v20  ;;  %v2039_v35 = vld [vmem:[%s3231_s0 + $0xe8] sm:$0xff]   ;;  %v2040_v36 = vld [vmem:[%s3231_s0 + $0xf0] sm:$0xff]   ;;  %v2025_v37 = vld [vmem:[%s3231_s0 + $0x78] sm:$0xff]  }
  0x28   :  { %v2041_v38 = vld [vmem:[%s3231_s0 + $0xf8] sm:$0xff]   ;;  %v88_v39 = vld [vmem:[#allocation2 + $0x10] sm:$0xff]  ;;  %v86_v40 = vld [vmem:[#allocation2] sm:$0xff] }
  0x29   :  { %v89_v42 = vld [vmem:[#allocation2 + $0x18] sm:$0xff]  ;;  %v120_v43 = vld [vmem:[#allocation2 + $0x110] sm:$0xff]  ;;  %v87_v46 = vld [vmem:[#allocation2 + $0x8] sm:$0xff] }
  0x2a   :  { %v118_v47 = vld [vmem:[#allocation2 + $0x100] sm:$0xff]  ;;  %v121_v51 = vld [vmem:[#allocation2 + $0x118] sm:$0xff]  ;;  %v119_v56 = vld [vmem:[#allocation2 + $0x108] sm:$0xff] }
  0x2b   :  { %v92_v62 = vld [vmem:[#allocation2 + $0x30] sm:$0xff]  ;;  %v90_v0 = vld [vmem:[#allocation2 + $0x20] sm:$0xff]  ;;  %v93_v2 = vld [vmem:[#allocation2 + $0x38] sm:$0xff] }
  0x2c   :  { %v91_v5 = vld [vmem:[#allocation2 + $0x28] sm:$0xff] }
  0x2e   :  { %1939 = vmatmul.mubr.msk.bf16.gmra.mrb[12].mxu0 %vm410_vm1, %v2017_v21  ;;  %1971 = vmatmul.mubr.msk.bf16.gmra.mrb[12].mxu1 %vm410_vm1, %v2033_v23 }
  0x2f   :  { %1942 = vmatprep.mubr.msk.bf16.mxu0 %vm410_vm1, %v2018_v22  ;;  %1974 = vmatprep.mubr.msk.bf16.mxu1 %vm410_vm1, %v2034_v24 }
  0x36   :  { %1943 = vmatmul.mubr.msk.bf16.gmra.mrb[16].mxu0 %vm410_vm1, %v2019_v25  ;;  %1975 = vmatmul.mubr.msk.bf16.gmra.mrb[16].mxu1 %vm410_vm1, %v2035_v27 }
  0x37   :  { %1946 = vmatprep.mubr.msk.bf16.mxu0 %vm410_vm1, %v2020_v26  ;;  %1978 = vmatprep.mubr.msk.bf16.mxu1 %vm410_vm1, %v2036_v28 }
  0x3e   :  { %1947 = vmatmul.mubr.msk.bf16.gmra.mrb[20].mxu0 %vm410_vm1, %v2021_v29  ;;  %1979 = vmatmul.mubr.msk.bf16.gmra.mrb[20].mxu1 %vm410_vm1, %v2037_v31 }
  0x3f   :  { %1950 = vmatprep.mubr.msk.bf16.mxu0 %vm410_vm1, %v2022_v30  ;;  %1982 = vmatprep.mubr.msk.bf16.mxu1 %vm410_vm1, %v2038_v32  ;;  %v96_v30 = vld [vmem:[#allocation2 + $0x50] sm:$0xff] }
  0x46   :  { %1951 = vmatmul.mubr.msk.bf16.gmra.mrb[24].mxu0 %vm410_vm1, %v2023_v33  ;;  %1983 = vmatmul.mubr.msk.bf16.gmra.mrb[24].mxu1 %vm410_vm1, %v2039_v35  ;;  %v94_v33 = vld [vmem:[#allocation2 + $0x40] sm:$0xff] }
  0x47   :  { %1954 = vmatprep.mubr.msk.bf16.mxu0 %vm410_vm1, %v2024_v34  ;;  %1986 = vmatprep.mubr.msk.bf16.mxu1 %vm410_vm1, %v2040_v36 }
  0x4e   :  { %1955 = vmatmul.mubr.msk.bf16.gmra.mrb[28].mxu0 %vm410_vm1, %v2025_v37  ;;  %1987 = vmatmul.mubr.msk.bf16.gmra.mrb[28].mxu1 %vm410_vm1, %v2041_v38 }
  0xe9   :  { %v1928_v41 = vpop.f32.mrb[0].mxu0  ;;  %v1960_v50 = vpop.f32.mrb[0].mxu1 }
  0xea   :  { %v802_v44 = vadd.f32 %v1928_v41, %v88_v39  ;;  %v545_v45 = vpop.f32.mrb[1].mxu0  ;;  %v834_v54 = vadd.f32 %v1960_v50, %v120_v43  ;;  %v673_v55 = vpop.f32.mrb[1].mxu1 }
  0xeb   :  { %v800_v48 = vadd.f32 %v545_v45, %v86_v40  ;;  %v1929_v49 = vpop.f32.mrb[2].mxu0  ;;  %v832_v58 = vadd.f32 %v673_v55, %v118_v47  ;;  %v1961_v59 = vpop.f32.mrb[2].mxu1 }
  0xec   :  { %867 = vst.msk [vmem:[#allocation2 + $0x10] sm:$0xff] %vm21_vm0, %v802_v44  ;;  %v803_v52 = vadd.f32 %v1929_v49, %v89_v42  ;;  %v548_v53 = vpop.f32.mrb[3].mxu0  ;;  %899 = vst.msk [vmem:[#allocation2 + $0x110] sm:$0xff] %vm21_vm0, %v834_v54  ;;  %v835_v60 = vadd.f32 %v1961_v59, %v121_v51  ;;  %v676_v61 = vpop.f32.mrb[3].mxu1 }
  0xed   :  { %865 = vst.msk [vmem:[#allocation2] sm:$0xff] %vm21_vm0, %v800_v48  ;;  %v801_v57 = vadd.f32 %v548_v53, %v87_v46  ;;  %897 = vst.msk [vmem:[#allocation2 + $0x100] sm:$0xff] %vm21_vm0, %v832_v58  ;;  %v833_v63 = vadd.f32 %v676_v61, %v119_v56 }
  0xee   :  { %868 = vst.msk [vmem:[#allocation2 + $0x18] sm:$0xff] %vm21_vm0, %v803_v52  ;;  %900 = vst.msk [vmem:[#allocation2 + $0x118] sm:$0xff] %vm21_vm0, %v835_v60 }
  0xef   :  { %866 = vst.msk [vmem:[#allocation2 + $0x8] sm:$0xff] %vm21_vm0, %v801_v57  ;;  %898 = vst.msk [vmem:[#allocation2 + $0x108] sm:$0xff] %vm21_vm0, %v833_v63  ;;  %v97_v63 = vld [vmem:[#allocation2 + $0x58] sm:$0xff] }
  0xf1   :  { %v1932_v1 = vpop.f32.mrb[4].mxu0  ;;  %v2409_v9 = vpop.f32.mrb[4].mxu1 }
  0xf2   :  { %v806_v3 = vadd.f32 %v1932_v1, %v92_v62  ;;  %v561_v4 = vpop.f32.mrb[5].mxu0  ;;  %v2412_v14 = vpop.f32.mrb[5].mxu1 }
  0xf3   :  { %v934_v6 = vld [vmem:[#allocation2 + $0x10] sm:$0xff]  ;;  %v804_v7 = vadd.f32 %v561_v4, %v90_v0  ;;  %v1933_v8 = vpop.f32.mrb[6].mxu0  ;;  %v2417_v20 = vpop.f32.mrb[6].mxu1  ;;  %v95_v4 = vld [vmem:[#allocation2 + $0x48] sm:$0xff] }
  0xf4   :  { %v1817_v10 = vpack.c.bf16 %v934_v6, %v934_v6  ;;  %v932_v11 = vld [vmem:[#allocation2] sm:$0xff]  ;;  %871 = vst.msk [vmem:[#allocation2 + $0x30] sm:$0xff] %vm21_vm0, %v806_v3  ;;  %v807_v12 = vadd.f32 %v1933_v8, %v93_v2  ;;  %v564_v13 = vpop.f32.mrb[7].mxu0  ;;  %v2415_v19 = vld [vmem:[#allocation2 + $0x110] sm:$0xff]  ;;  %v1454_v21 = vmul.f32 %v934_v6, %v934_v6  ;;  %v2426_v25 = vpop.f32.mrb[7].mxu1  ;;  %v1320_v36 = vsel %vm21_vm0, %v934_v6, 0.0 }
  0xf5   :  { %v1815_v15 = vpack.c.bf16 %v932_v11, %v932_v11  ;;  %v1452_v16 = vmul.f32 %v932_v11, %v932_v11  ;;  %v935_v17 = vld [vmem:[#allocation2 + $0x18] sm:$0xff]  ;;  %869 = vst.msk [vmem:[#allocation2 + $0x20] sm:$0xff] %vm21_vm0, %v804_v7  ;;  %v805_v18 = vadd.f32 %v564_v13, %v91_v5  ;;  %v2424_v24 = vld [vmem:[#allocation2 + $0x100] sm:$0xff]  ;;  %v1317_v26 = vsel %vm21_vm0, %v932_v11, 0.0  ;;  %v100_v11 = vld [vmem:[#allocation2 + $0x70] sm:$0xff] }
  0xf6   :  { %1255 = vst.msk [vmem:[%s3233_s2 + $0x8] sm:$0xf] %vm1252_vm3, %v1817_v10  ;;  %v1818_v22 = vpack.c.bf16 %v935_v17, %v935_v17  ;;  %v933_v23 = vld [vmem:[#allocation2 + $0x8] sm:$0xff]  ;;  %v1455_v31 = vmul.f32 %v935_v17, %v935_v17  ;;  %v1849_v34 = vpack.c.bf16 %v2415_v19, %v2415_v19  ;;  %v2441_v35 = vld [vmem:[#allocation2 + $0x118] sm:$0xff]  ;;  %v1847_v40 = vpack.c.bf16 %v2424_v24, %v2424_v24 }
  0xf7   :  { %872 = vst.msk [vmem:[#allocation2 + $0x38] sm:$0xff] %vm21_vm0, %v807_v12  ;;  %v1816_v27 = vpack.c.bf16 %v933_v23, %v933_v23  ;;  %v1318_v28 = vsel %vm21_vm0, %v933_v23, 0.0  ;;  %v1453_v29 = vmul.f32 %v933_v23, %v933_v23  ;;  %870 = vst.msk [vmem:[#allocation2 + $0x28] sm:$0xff] %vm21_vm0, %v805_v18  ;;  %v1516_v37 = vsel %vm21_vm0, %v1452_v16, 0.0  ;;  %v2489_v12 = vld [vmem:[#allocation2 + $0x108] sm:$0xff]  ;;  %v98_v18 = vld [vmem:[#allocation2 + $0x60] sm:$0xff] }
  0xf8   :  { %1253 = vst.msk [vmem:[%s3233_s2] sm:$0xf] %vm1252_vm3, %v1815_v15  ;;  %1256 = vst.msk [vmem:[%s3233_s2 + $0xc] sm:$0xf] %vm1252_vm3, %v1818_v22  ;;  %v1319_v32 = vadd.f32 %v1318_v28, %v1317_v26  ;;  %v1519_v45 = vsel %vm21_vm0, %v1454_v21, 0.0  ;;  %v1850_v49 = vpack.c.bf16 %v2441_v35, %v2441_v35  ;;  %v1322_v51 = vsel %vm21_vm0, %v935_v17, 0.0 }
  0xf9   :  { %1254 = vst.msk [vmem:[%s3233_s2 + $0x4] sm:$0xf] %vm1252_vm3, %v1816_v27  ;;  %v1517_v38 = vsel %vm21_vm0, %v1453_v29, 0.0  ;;  %v1936_v39 = vpop.f32.mrb[8].mxu0  ;;  %1287 = vst.msk [vmem:[%s3233_s2 + $0x88] sm:$0xf] %vm1252_vm3, %v1849_v34 }
  0xfa   :  { %v1321_v41 = vadd.f32 %v1320_v36, %v1319_v32  ;;  %v1518_v42 = vadd.f32 %v1517_v38, %v1516_v37  ;;  %v810_v43 = vadd.f32 %v1936_v39, %v96_v30  ;;  %v577_v44 = vpop.f32.mrb[9].mxu0  ;;  %1285 = vst.msk [vmem:[%s3233_s2 + $0x80] sm:$0xf] %vm1252_vm3, %v1847_v40  ;;  %v2463_v50 = vpop.f32.mrb[8].mxu1  ;;  %v1521_v52 = vsel %vm21_vm0, %v1455_v31, 0.0  ;;  %v101_v27 = vld [vmem:[#allocation2 + $0x78] sm:$0xff] }
  0xfb   :  { %v938_v46 = vld [vmem:[#allocation2 + $0x30] sm:$0xff]  ;;  %v808_v47 = vadd.f32 %v577_v44, %v94_v33  ;;  %v1937_v48 = vpop.f32.mrb[10].mxu0  ;;  %v2468_v57 = vpop.f32.mrb[9].mxu1  ;;  %1288 = vst.msk [vmem:[%s3233_s2 + $0x8c] sm:$0xf] %vm1252_vm3, %v1850_v49  ;;  %v1848_v32 = vpack.c.bf16 %v2489_v12, %v2489_v12  ;;  %v99_v39 = vld [vmem:[#allocation2 + $0x68] sm:$0xff] }
  0xfc   :  { %v1520_v53 = vadd.f32 %v1519_v45, %v1518_v42  ;;  %v1821_v54 = vpack.c.bf16 %v938_v46, %v938_v46  ;;  %v936_v55 = vld [vmem:[#allocation2 + $0x20] sm:$0xff]  ;;  %875 = vst.msk [vmem:[#allocation2 + $0x50] sm:$0xff] %vm21_vm0, %v810_v43  ;;  %v580_v56 = vpop.f32.mrb[11].mxu0  ;;  %v1323_v59 = vadd.f32 %v1322_v51, %v1321_v41  ;;  %v2476_v0 = vpop.f32.mrb[10].mxu1  ;;  %v1458_v6 = vmul.f32 %v938_v46, %v938_v46 }
  0xfd   :  { %v1819_v58 = vpack.c.bf16 %v936_v55, %v936_v55  ;;  %v1324_v60 = vsel %vm21_vm0, %v936_v55, 0.0  ;;  %v1456_v61 = vmul.f32 %v936_v55, %v936_v55  ;;  %873 = vst.msk [vmem:[#allocation2 + $0x40] sm:$0xff] %vm21_vm0, %v808_v47  ;;  %v2482_v5 = vpop.f32.mrb[11].mxu1  ;;  %v811_v17 = vadd.f32 %v1937_v48, %v97_v63  ;;  %v124_v47 = vld [vmem:[#allocation2 + $0x130] sm:$0xff]  ;;  %v125_v55 = vld [vmem:[#allocation2 + $0x138] sm:$0xff]  ;;  %v126_v63 = vld [vmem:[#allocation2 + $0x140] sm:$0xff] }
  0xfe   :  { %v939_v62 = vld [vmem:[#allocation2 + $0x38] sm:$0xff]  ;;  %1259 = vst.msk [vmem:[%s3233_s2 + $0x18] sm:$0xf] %vm1252_vm3, %v1821_v54  ;;  %v1522_v1 = vadd.f32 %v1521_v52, %v1520_v53  ;;  %v937_v3 = vld [vmem:[#allocation2 + $0x28] sm:$0xff]  ;;  %v1325_v7 = vadd.f32 %v1324_v60, %v1323_v59  ;;  %v1328_v21 = vsel %vm21_vm0, %v938_v46, 0.0  ;;  %v809_v23 = vadd.f32 %v580_v56, %v95_v4  ;;  %v122_v54 = vld [vmem:[#allocation2 + $0x120] sm:$0xff] }
  0xff   :  { %v1822_v2 = vpack.c.bf16 %v939_v62, %v939_v62  ;;  %1257 = vst.msk [vmem:[%s3233_s2 + $0x10] sm:$0xf] %vm1252_vm3, %v1819_v58  ;;  %v1523_v8 = vsel %vm21_vm0, %v1456_v61, 0.0  ;;  %v1820_v10 = vpack.c.bf16 %v937_v3, %v937_v3  ;;  %v1326_v15 = vsel %vm21_vm0, %v937_v3, 0.0  ;;  %1286 = vst.msk [vmem:[%s3233_s2 + $0x84] sm:$0xf] %vm1252_vm3, %v1848_v32 }
 0x100   :  { %v1524_v13 = vadd.f32 %v1523_v8, %v1522_v1  ;;  %v1457_v16 = vmul.f32 %v937_v3, %v937_v3  ;;  %v1327_v22 = vadd.f32 %v1326_v15, %v1325_v7  ;;  %v1459_v28 = vmul.f32 %v939_v62, %v939_v62  ;;  %876 = vst.msk [vmem:[#allocation2 + $0x58] sm:$0xff] %vm21_vm0, %v811_v17  ;;  %v123_v56 = vld [vmem:[#allocation2 + $0x128] sm:$0xff]  ;;  %v104_v4 = vld [vmem:[#allocation2 + $0x90] sm:$0xff]  ;;  %v102_v8 = vld [vmem:[#allocation2 + $0x80] sm:$0xff] }
 0x101   :  { %1260 = vst.msk [vmem:[%s3233_s2 + $0x1c] sm:$0xf] %vm1252_vm3, %v1822_v2  ;;  %1258 = vst.msk [vmem:[%s3233_s2 + $0x14] sm:$0xf] %vm1252_vm3, %v1820_v10  ;;  %v1940_v26 = vpop.f32.mrb[12].mxu0  ;;  %v2508_v40 = vpop.f32.mrb[12].mxu1  ;;  %v836_v10 = vadd.f32 %v2412_v14, %v122_v54 }
 0x102   :  { %v1525_v29 = vsel %vm21_vm0, %v1457_v16, 0.0  ;;  %v814_v30 = vadd.f32 %v1940_v26, %v100_v11  ;;  %v593_v31 = vpop.f32.mrb[13].mxu0  ;;  %v1329_v33 = vadd.f32 %v1328_v21, %v1327_v22  ;;  %874 = vst.msk [vmem:[#allocation2 + $0x48] sm:$0xff] %vm21_vm0, %v809_v23  ;;  %v1527_v41 = vsel %vm21_vm0, %v1458_v6, 0.0  ;;  %v2519_v48 = vpop.f32.mrb[13].mxu1 }
 0x103   :  { %v1526_v34 = vadd.f32 %v1525_v29, %v1524_v13  ;;  %v2505_v36 = vld [vmem:[#allocation2 + $0x50] sm:$0xff]  ;;  %v812_v37 = vadd.f32 %v593_v31, %v98_v18  ;;  %v1941_v38 = vpop.f32.mrb[14].mxu0  ;;  %v1330_v42 = vsel %vm21_vm0, %v939_v62, 0.0  ;;  %v2523_v58 = vpop.f32.mrb[14].mxu1  ;;  %v1529_v59 = vsel %vm21_vm0, %v1459_v28, 0.0  ;;  %901 = vst.msk [vmem:[#allocation2 + $0x120] sm:$0xff] %vm21_vm0, %v836_v10 }
 0x104   :  { %v1825_v43 = vpack.c.bf16 %v2505_v36, %v2505_v36  ;;  %v940_v44 = vld [vmem:[#allocation2 + $0x40] sm:$0xff]  ;;  %879 = vst.msk [vmem:[#allocation2 + $0x70] sm:$0xff] %vm21_vm0, %v814_v30  ;;  %v815_v45 = vadd.f32 %v1941_v38, %v101_v27  ;;  %v596_v46 = vpop.f32.mrb[15].mxu0  ;;  %v1331_v52 = vadd.f32 %v1330_v42, %v1329_v33  ;;  %v128_v62 = vld [vmem:[#allocation2 + $0x150] sm:$0xff]  ;;  %v2531_v1 = vpop.f32.mrb[15].mxu1  ;;  %v838_v6 = vadd.f32 %v2409_v9, %v124_v47 }
 0x105   :  { %v1528_v49 = vadd.f32 %v1527_v41, %v1526_v34  ;;  %v1823_v51 = vpack.c.bf16 %v940_v44, %v940_v44  ;;  %v1332_v53 = vsel %vm21_vm0, %v940_v44, 0.0  ;;  %877 = vst.msk [vmem:[#allocation2 + $0x60] sm:$0xff] %vm21_vm0, %v812_v37  ;;  %v1460_v60 = vmul.f32 %v940_v44, %v940_v44  ;;  %v105_v34 = vld [vmem:[#allocation2 + $0x98] sm:$0xff] }
 0x106   :  { %1263 = vst.msk [vmem:[%s3233_s2 + $0x28] sm:$0xf] %vm1252_vm3, %v1825_v43  ;;  %v813_v61 = vadd.f32 %v596_v46, %v99_v39  ;;  %v1333_v2 = vadd.f32 %v1332_v53, %v1331_v52  ;;  %v839_v11 = vadd.f32 %v2417_v20, %v125_v55  ;;  %v837_v13 = vadd.f32 %v2426_v25, %v123_v56 }
 0x107   :  { %880 = vst.msk [vmem:[#allocation2 + $0x78] sm:$0xff] %vm21_vm0, %v815_v45  ;;  %v1530_v3 = vadd.f32 %v1529_v59, %v1528_v49  ;;  %v1531_v7 = vsel %vm21_vm0, %v1460_v60, 0.0  ;;  %v943_v15 = vld [vmem:[#allocation2 + $0x58] sm:$0xff]  ;;  %903 = vst.msk [vmem:[#allocation2 + $0x130] sm:$0xff] %vm21_vm0, %v838_v6  ;;  %v842_v17 = vadd.f32 %v2463_v50, %v128_v62  ;;  %v840_v18 = vadd.f32 %v2468_v57, %v126_v63  ;;  %v103_v49 = vld [vmem:[#allocation2 + $0x88] sm:$0xff] }
 0x108   :  { %1261 = vst.msk [vmem:[%s3233_s2 + $0x20] sm:$0xf] %vm1252_vm3, %v1823_v51  ;;  %v1462_v9 = vmul.f32 %v2505_v36, %v2505_v36  ;;  %v1826_v22 = vpack.c.bf16 %v943_v15, %v943_v15  ;;  %v1463_v30 = vmul.f32 %v943_v15, %v943_v15  ;;  %v1336_v39 = vsel %vm21_vm0, %v2505_v36, 0.0  ;;  %v108_v59 = vld [vmem:[#allocation2 + $0xb0] sm:$0xff] }
 0x109   :  { %878 = vst.msk [vmem:[#allocation2 + $0x68] sm:$0xff] %vm21_vm0, %v813_v61  ;;  %v1944_v16 = vpop.f32.mrb[16].mxu0  ;;  %v1532_v21 = vadd.f32 %v1531_v7, %v1530_v3  ;;  %v941_v23 = vld [vmem:[#allocation2 + $0x48] sm:$0xff]  ;;  %904 = vst.msk [vmem:[#allocation2 + $0x138] sm:$0xff] %vm21_vm0, %v839_v11  ;;  %v2556_v29 = vpop.f32.mrb[16].mxu1  ;;  %v1338_v53 = vsel %vm21_vm0, %v943_v15, 0.0 }
 0x10a   :  { %v818_v26 = vadd.f32 %v1944_v16, %v104_v4  ;;  %v609_v14 = vpop.f32.mrb[17].mxu0  ;;  %902 = vst.msk [vmem:[#allocation2 + $0x128] sm:$0xff] %vm21_vm0, %v837_v13  ;;  %v1824_v20 = vpack.c.bf16 %v941_v23, %v941_v23  ;;  %v1334_v25 = vsel %vm21_vm0, %v941_v23, 0.0  ;;  %v1461_v50 = vmul.f32 %v941_v23, %v941_v23  ;;  %907 = vst.msk [vmem:[#allocation2 + $0x150] sm:$0xff] %vm21_vm0, %v842_v17  ;;  %v2565_v38 = vpop.f32.mrb[17].mxu1  ;;  %v109_v23 = vld [vmem:[#allocation2 + $0xb8] sm:$0xff] }
 0x10b   :  { %v2552_v27 = vld [vmem:[#allocation2 + $0x70] sm:$0xff]  ;;  %v816_v57 = vadd.f32 %v609_v14, %v102_v8  ;;  %v1945_v28 = vpop.f32.mrb[18].mxu0  ;;  %905 = vst.msk [vmem:[#allocation2 + $0x140] sm:$0xff] %vm21_vm0, %v840_v18  ;;  %v1335_v31 = vadd.f32 %v1334_v25, %v1333_v2  ;;  %v2577_v44 = vpop.f32.mrb[18].mxu1  ;;  %v1535_v52 = vsel %vm21_vm0, %v1462_v9, 0.0  ;;  %v1537_v60 = vsel %vm21_vm0, %v1463_v30, 0.0 }
 0x10c   :  { %1264 = vst.msk [vmem:[%s3233_s2 + $0x2c] sm:$0xf] %vm1252_vm3, %v1826_v22  ;;  %v1829_v32 = vpack.c.bf16 %v2552_v27, %v2552_v27  ;;  %v944_v33 = vld [vmem:[#allocation2 + $0x60] sm:$0xff]  ;;  %v612_v37 = vpop.f32.mrb[19].mxu0  ;;  %1262 = vst.msk [vmem:[%s3233_s2 + $0x24] sm:$0xf] %vm1252_vm3, %v1824_v20  ;;  %v819_v56 = vadd.f32 %v1945_v28, %v105_v34  ;;  %v1466_v18 = vmul.f32 %v2552_v27, %v2552_v27 }
 0x10d   :  { %883 = vst.msk [vmem:[#allocation2 + $0x90] sm:$0xff] %vm21_vm0, %v818_v26  ;;  %v1533_v41 = vsel %vm21_vm0, %v1461_v50, 0.0  ;;  %v1827_v42 = vpack.c.bf16 %v944_v33, %v944_v33  ;;  %881 = vst.msk [vmem:[#allocation2 + $0x80] sm:$0xff] %vm21_vm0, %v816_v57  ;;  %v1337_v45 = vadd.f32 %v1336_v39, %v1335_v31  ;;  %v1464_v36 = vmul.f32 %v944_v33, %v944_v33  ;;  %v2585_v51 = vpop.f32.mrb[19].mxu1  ;;  %v106_v2 = vld [vmem:[#allocation2 + $0xa0] sm:$0xff]  ;;  %v107_v14 = vld [vmem:[#allocation2 + $0xa8] sm:$0xff] }
 0x10e   :  { %v2574_v43 = vld [vmem:[#allocation2 + $0x78] sm:$0xff]  ;;  %v1534_v46 = vadd.f32 %v1533_v41, %v1532_v21  ;;  %1267 = vst.msk [vmem:[%s3233_s2 + $0x38] sm:$0xf] %vm1252_vm3, %v1829_v32  ;;  %v1340_v54 = vsel %vm21_vm0, %v944_v33, 0.0  ;;  %v2599_v3 = vld [vmem:[#allocation2 + $0x130] sm:$0xff]  ;;  %v817_v8 = vadd.f32 %v612_v37, %v103_v49  ;;  %v2623_v32 = vld [vmem:[#allocation2 + $0x120] sm:$0xff] }
 0x10f   :  { %v1830_v47 = vpack.c.bf16 %v2574_v43, %v2574_v43  ;;  %1265 = vst.msk [vmem:[%s3233_s2 + $0x30] sm:$0xf] %vm1252_vm3, %v1827_v42  ;;  %v1339_v62 = vadd.f32 %v1338_v53, %v1337_v45  ;;  %v1539_v4 = vsel %vm21_vm0, %v1464_v36, 0.0  ;;  %v1853_v17 = vpack.c.bf16 %v2599_v3, %v2599_v3 }
 0x110   :  { %v945_v55 = vld [vmem:[#allocation2 + $0x68] sm:$0xff]  ;;  %v1536_v61 = vadd.f32 %v1535_v52, %v1534_v46  ;;  %884 = vst.msk [vmem:[#allocation2 + $0x98] sm:$0xff] %vm21_vm0, %v819_v56  ;;  %882 = vst.msk [vmem:[#allocation2 + $0x88] sm:$0xff] %vm21_vm0, %v817_v8  ;;  %v1467_v50 = vmul.f32 %v2574_v43, %v2574_v43  ;;  %v1344_v34 = vsel %vm21_vm0, %v2552_v27, 0.0  ;;  %v1543_v27 = vsel %vm21_vm0, %v1466_v18, 0.0  ;;  %v110_v18 = vld [vmem:[#allocation2 + $0xc0] sm:$0xff] }
 0x111   :  { %1268 = vst.msk [vmem:[%s3233_s2 + $0x3c] sm:$0xf] %vm1252_vm3, %v1830_v47  ;;  %v1828_v63 = vpack.c.bf16 %v945_v55, %v945_v55  ;;  %v1342_v6 = vsel %vm21_vm0, %v945_v55, 0.0  ;;  %v1465_v7 = vmul.f32 %v945_v55, %v945_v55  ;;  %v1948_v10 = vpop.f32.mrb[20].mxu0  ;;  %v1341_v11 = vadd.f32 %v1340_v54, %v1339_v62  ;;  %v2614_v20 = vpop.f32.mrb[20].mxu1  ;;  %v2636_v47 = vld [vmem:[#allocation2 + $0x138] sm:$0xff] }
 0x112   :  { %v1538_v13 = vadd.f32 %v1537_v60, %v1536_v61  ;;  %v822_v15 = vadd.f32 %v1948_v10, %v108_v59  ;;  %v625_v16 = vpop.f32.mrb[21].mxu0  ;;  %1291 = vst.msk [vmem:[%s3233_s2 + $0x98] sm:$0xf] %vm1252_vm3, %v1853_v17  ;;  %v2625_v33 = vpop.f32.mrb[21].mxu1  ;;  %v1346_v52 = vsel %vm21_vm0, %v2574_v43, 0.0  ;;  %v112_v54 = vld [vmem:[#allocation2 + $0xd0] sm:$0xff]  ;;  %v1851_v55 = vpack.c.bf16 %v2623_v32, %v2623_v32 }
 0x113   :  { %1266 = vst.msk [vmem:[%s3233_s2 + $0x34] sm:$0xf] %vm1252_vm3, %v1828_v63  ;;  %v1541_v9 = vsel %vm21_vm0, %v1465_v7, 0.0  ;;  %v820_v22 = vadd.f32 %v625_v16, %v106_v2  ;;  %v1949_v26 = vpop.f32.mrb[22].mxu0  ;;  %v1343_v57 = vadd.f32 %v1342_v6, %v1341_v11  ;;  %v2630_v41 = vpop.f32.mrb[22].mxu1  ;;  %v1545_v56 = vsel %vm21_vm0, %v1467_v50, 0.0 }
 0x114   :  { %v950_v21 = vld [vmem:[#allocation2 + $0x90] sm:$0xff]  ;;  %v1540_v25 = vadd.f32 %v1539_v4, %v1538_v13  ;;  %v948_v30 = vld [vmem:[#allocation2 + $0x80] sm:$0xff]  ;;  %887 = vst.msk [vmem:[#allocation2 + $0xb0] sm:$0xff] %vm21_vm0, %v822_v15  ;;  %v628_v31 = vpop.f32.mrb[23].mxu0  ;;  %v823_v46 = vadd.f32 %v1949_v26, %v109_v23  ;;  %v2638_v49 = vpop.f32.mrb[23].mxu1  ;;  %v1854_v4 = vpack.c.bf16 %v2636_v47, %v2636_v47 }
 0x115   :  { %v1833_v28 = vpack.c.bf16 %v950_v21, %v950_v21  ;;  %v1831_v37 = vpack.c.bf16 %v948_v30, %v948_v30  ;;  %v1468_v39 = vmul.f32 %v948_v30, %v948_v30  ;;  %885 = vst.msk [vmem:[#allocation2 + $0xa0] sm:$0xff] %vm21_vm0, %v820_v22  ;;  %v1345_v42 = vadd.f32 %v1344_v34, %v1343_v57  ;;  %v113_v57 = vld [vmem:[#allocation2 + $0xd8] sm:$0xff] }
 0x116   :  { %v1542_v45 = vadd.f32 %v1541_v9, %v1540_v25  ;;  %v821_v36 = vadd.f32 %v628_v31, %v107_v14  ;;  %v1348_v53 = vsel %vm21_vm0, %v948_v30, 0.0  ;;  %888 = vst.msk [vmem:[#allocation2 + $0xb8] sm:$0xff] %vm21_vm0, %v823_v46  ;;  %v1470_v43 = vmul.f32 %v950_v21, %v950_v21 }
 0x117   :  { %1271 = vst.msk [vmem:[%s3233_s2 + $0x48] sm:$0xf] %vm1252_vm3, %v1833_v28  ;;  %1269 = vst.msk [vmem:[%s3233_s2 + $0x40] sm:$0xf] %vm1252_vm3, %v1831_v37  ;;  %v1347_v60 = vadd.f32 %v1346_v52, %v1345_v42  ;;  %v951_v61 = vld [vmem:[#allocation2 + $0x98] sm:$0xff]  ;;  %v1547_v62 = vsel %vm21_vm0, %v1468_v39, 0.0 }
 0x118   :  { %v1544_v59 = vadd.f32 %v1543_v27, %v1542_v45  ;;  %886 = vst.msk [vmem:[#allocation2 + $0xa8] sm:$0xff] %vm21_vm0, %v821_v36  ;;  %v1834_v63 = vpack.c.bf16 %v951_v61, %v951_v61  ;;  %v949_v8 = vld [vmem:[#allocation2 + $0x88] sm:$0xff]  ;;  %v1352_v23 = vsel %vm21_vm0, %v950_v21, 0.0  ;;  %v1551_v34 = vsel %vm21_vm0, %v1470_v43, 0.0  ;;  %v116_v43 = vld [vmem:[#allocation2 + $0xf0] sm:$0xff] }
 0x119   :  { %v1952_v2 = vpop.f32.mrb[24].mxu0  ;;  %1289 = vst.msk [vmem:[%s3233_s2 + $0x90] sm:$0xf] %vm1252_vm3, %v1851_v55  ;;  %v1349_v6 = vadd.f32 %v1348_v53, %v1347_v60  ;;  %v1832_v13 = vpack.c.bf16 %v949_v8, %v949_v8  ;;  %v1350_v15 = vsel %vm21_vm0, %v949_v8, 0.0  ;;  %v1469_v16 = vmul.f32 %v949_v8, %v949_v8  ;;  %1292 = vst.msk [vmem:[%s3233_s2 + $0x9c] sm:$0xf] %vm1252_vm3, %v1854_v4 }
 0x11a   :  { %v1546_v7 = vadd.f32 %v1545_v56, %v1544_v59  ;;  %v826_v10 = vadd.f32 %v1952_v2, %v112_v54  ;;  %v641_v11 = vpop.f32.mrb[25].mxu0  ;;  %1272 = vst.msk [vmem:[%s3233_s2 + $0x4c] sm:$0xf] %vm1252_vm3, %v1834_v63  ;;  %v2671_v22 = vpop.f32.mrb[24].mxu1  ;;  %v111_v28 = vld [vmem:[#allocation2 + $0xc8] sm:$0xff]  ;;  %v1471_v37 = vmul.f32 %v951_v61, %v951_v61  ;;  %v1354_v53 = vsel %vm21_vm0, %v951_v61, 0.0 }
 0x11b   :  { %v2665_v17 = vld [vmem:[#allocation2 + $0xb0] sm:$0xff]  ;;  %v1953_v9 = vpop.f32.mrb[26].mxu0  ;;  %v1351_v14 = vadd.f32 %v1350_v15, %v1349_v6  ;;  %v2677_v31 = vpop.f32.mrb[25].mxu1  ;;  %1270 = vst.msk [vmem:[%s3233_s2 + $0x44] sm:$0xf] %vm1252_vm3, %v1832_v13  ;;  %v1549_v21 = vsel %vm21_vm0, %v1469_v16, 0.0  ;;  %v824_v27 = vadd.f32 %v641_v11, %v110_v18 }
 0x11c   :  { %v1548_v26 = vadd.f32 %v1547_v62, %v1546_v7  ;;  %v1837_v25 = vpack.c.bf16 %v2665_v17, %v2665_v17  ;;  %v952_v50 = vld [vmem:[#allocation2 + $0xa0] sm:$0xff]  ;;  %891 = vst.msk [vmem:[#allocation2 + $0xd0] sm:$0xff] %vm21_vm0, %v826_v10  ;;  %v644_v30 = vpop.f32.mrb[27].mxu0  ;;  %v2685_v42 = vpop.f32.mrb[26].mxu1  ;;  %v827_v59 = vadd.f32 %v1953_v9, %v113_v57  ;;  %v2700_v6 = vld [vmem:[#allocation2 + $0x128] sm:$0xff]  ;;  %v1553_v61 = vsel %vm21_vm0, %v1471_v37, 0.0 }
 0x11d   :  { %v1835_v39 = vpack.c.bf16 %v952_v50, %v952_v50  ;;  %v1353_v45 = vadd.f32 %v1352_v23, %v1351_v14  ;;  %v1472_v36 = vmul.f32 %v952_v50, %v952_v50  ;;  %v2691_v52 = vpop.f32.mrb[27].mxu1  ;;  %v1356_v54 = vsel %vm21_vm0, %v952_v50, 0.0  ;;  %v955_v55 = vld [vmem:[#allocation2 + $0xb8] sm:$0xff]  ;;  %889 = vst.msk [vmem:[#allocation2 + $0xc0] sm:$0xff] %vm21_vm0, %v824_v27  ;;  %v114_v4 = vld [vmem:[#allocation2 + $0xe0] sm:$0xff] }
 0x11e   :  { %v1550_v46 = vadd.f32 %v1549_v21, %v1548_v26  ;;  %1275 = vst.msk [vmem:[%s3233_s2 + $0x58] sm:$0xf] %vm1252_vm3, %v1837_v25  ;;  %v825_v60 = vadd.f32 %v644_v30, %v111_v28  ;;  %v1838_v2 = vpack.c.bf16 %v955_v55, %v955_v55  ;;  %v117_v23 = vld [vmem:[#allocation2 + $0xf8] sm:$0xff]  ;;  %v115_v26 = vld [vmem:[#allocation2 + $0xe8] sm:$0xff]  ;;  %v1474_v14 = vmul.f32 %v2665_v17, %v2665_v17 }
 0x11f   :  { %1273 = vst.msk [vmem:[%s3233_s2 + $0x50] sm:$0xf] %vm1252_vm3, %v1835_v39  ;;  %v953_v56 = vld [vmem:[#allocation2 + $0xa8] sm:$0xff]  ;;  %v1355_v63 = vadd.f32 %v1354_v53, %v1353_v45  ;;  %v1555_v7 = vsel %vm21_vm0, %v1472_v36, 0.0  ;;  %v1852_v28 = vpack.c.bf16 %v2700_v6, %v2700_v6  ;;  %v1360_v27 = vsel %vm21_vm0, %v2665_v17, 0.0 }
 0x120   :  { %v1552_v62 = vadd.f32 %v1551_v34, %v1550_v46  ;;  %v1836_v8 = vpack.c.bf16 %v953_v56, %v953_v56  ;;  %v1358_v10 = vsel %vm21_vm0, %v953_v56, 0.0  ;;  %892 = vst.msk [vmem:[#allocation2 + $0xd8] sm:$0xff] %vm21_vm0, %v827_v59  ;;  %890 = vst.msk [vmem:[#allocation2 + $0xc8] sm:$0xff] %vm21_vm0, %v825_v60  ;;  %v1473_v16 = vmul.f32 %v953_v56, %v953_v56  ;;  %v2723_v46 = vld [vmem:[#allocation2 + $0x150] sm:$0xff] }
 0x121   :  { %v1956_v11 = vpop.f32.mrb[28].mxu0  ;;  %v1357_v13 = vadd.f32 %v1356_v54, %v1355_v63  ;;  %1276 = vst.msk [vmem:[%s3233_s2 + $0x5c] sm:$0xf] %vm1252_vm3, %v1838_v2  ;;  %v2719_v30 = vpop.f32.mrb[28].mxu1  ;;  %v1475_v53 = vmul.f32 %v955_v55, %v955_v55  ;;  %1290 = vst.msk [vmem:[%s3233_s2 + $0x94] sm:$0xf] %vm1252_vm3, %v1852_v28  ;;  %v2742_v17 = vmul.f32 %v2415_v19, %v2415_v19 }
 0x122   :  { %v1554_v15 = vadd.f32 %v1553_v61, %v1552_v62  ;;  %v830_v18 = vadd.f32 %v1956_v11, %v116_v43  ;;  %v657_v9 = vpop.f32.mrb[29].mxu0  ;;  %1274 = vst.msk [vmem:[%s3233_s2 + $0x54] sm:$0xf] %vm1252_vm3, %v1836_v8  ;;  %v1557_v21 = vsel %vm21_vm0, %v1473_v16, 0.0  ;;  %v2725_v36 = vpop.f32.mrb[29].mxu1  ;;  %v2746_v62 = vsel %vm21_vm0, %v2424_v24, 0.0 }
 0x123   :  { %v958_v25 = vld [vmem:[#allocation2 + $0xd0] sm:$0xff]  ;;  %v828_v50 = vadd.f32 %v657_v9, %v114_v4  ;;  %v1957_v57 = vpop.f32.mrb[30].mxu0  ;;  %v1359_v37 = vadd.f32 %v1358_v10, %v1357_v13  ;;  %v2734_v59 = vpop.f32.mrb[30].mxu1  ;;  %v1559_v2 = vsel %vm21_vm0, %v1474_v14, 0.0  ;;  %v1362_v4 = vsel %vm21_vm0, %v955_v55, 0.0 }
 0x124   :  { %v1556_v34 = vadd.f32 %v1555_v7, %v1554_v15  ;;  %v1841_v39 = vpack.c.bf16 %v958_v25, %v958_v25  ;;  %895 = vst.msk [vmem:[#allocation2 + $0xf0] sm:$0xff] %vm21_vm0, %v830_v18  ;;  %v660_v45 = vpop.f32.mrb[31].mxu0  ;;  %v831_v54 = vadd.f32 %v1957_v57, %v117_v23  ;;  %v2748_v63 = vpop.f32.mrb[31].mxu1  ;;  %v956_v61 = vld [vmem:[#allocation2 + $0xc0] sm:$0xff]  ;;  %v1484_v7 = vmul.f32 %v2424_v24, %v2424_v24 }
 0x125   :  { %893 = vst.msk [vmem:[#allocation2 + $0xe0] sm:$0xff] %vm21_vm0, %v828_v50  ;;  %v829_v56 = vadd.f32 %v660_v45, %v115_v26  ;;  %v1361_v60 = vadd.f32 %v1360_v27, %v1359_v37  ;;  %v1857_v8 = vpack.c.bf16 %v2723_v46, %v2723_v46  ;;  %v1839_v11 = vpack.c.bf16 %v956_v61, %v956_v61 }
 0x126   :  { %v1558_v43 = vadd.f32 %v1557_v21, %v1556_v34  ;;  %1279 = vst.msk [vmem:[%s3233_s2 + $0x68] sm:$0xf] %vm1252_vm3, %v1841_v39  ;;  %v1364_v15 = vsel %vm21_vm0, %v956_v61, 0.0  ;;  %v1561_v55 = vsel %vm21_vm0, %v1475_v53, 0.0  ;;  %v1478_v9 = vmul.f32 %v958_v25, %v958_v25 }
 0x127   :  { %896 = vst.msk [vmem:[#allocation2 + $0xf8] sm:$0xff] %vm21_vm0, %v831_v54  ;;  %894 = vst.msk [vmem:[#allocation2 + $0xe8] sm:$0xff] %vm21_vm0, %v829_v56  ;;  %v1363_v13 = vadd.f32 %v1362_v4, %v1361_v60  ;;  %v959_v16 = vld [vmem:[#allocation2 + $0xd8] sm:$0xff]  ;;  %v957_v18 = vld [vmem:[#allocation2 + $0xc8] sm:$0xff]  ;;  %v1476_v23 = vmul.f32 %v956_v61, %v956_v61  ;;  %v2775_v39 = vsel %vm21_vm0, %v1484_v7, 0.0  ;;  %v2783_v56 = vmul.f32 %v2489_v12, %v2489_v12 }
 0x128   :  { %v1560_v10 = vadd.f32 %v1559_v2, %v1558_v43  ;;  %v1842_v26 = vpack.c.bf16 %v959_v16, %v959_v16  ;;  %1295 = vst.msk [vmem:[%s3233_s2 + $0xa8] sm:$0xf] %vm1252_vm3, %v1857_v8  ;;  %1277 = vst.msk [vmem:[%s3233_s2 + $0x60] sm:$0xf] %vm1252_vm3, %v1839_v11  ;;  %v1840_v50 = vpack.c.bf16 %v957_v18, %v957_v18  ;;  %v1366_v57 = vsel %vm21_vm0, %v957_v18, 0.0 }
 0x129   :  { %v1365_v24 = vadd.f32 %v1364_v15, %v1363_v13  ;;  %v1563_v28 = vsel %vm21_vm0, %v1476_v23, 0.0  ;;  %v1479_v34 = vmul.f32 %v959_v16, %v959_v16  ;;  %v1477_v37 = vmul.f32 %v957_v18, %v957_v18 }
 0x12a   :  { %v1562_v14 = vadd.f32 %v1561_v55, %v1560_v10  ;;  %1280 = vst.msk [vmem:[%s3233_s2 + $0x6c] sm:$0xf] %vm1252_vm3, %v1842_v26  ;;  %1278 = vst.msk [vmem:[%s3233_s2 + $0x64] sm:$0xf] %vm1252_vm3, %v1840_v50  ;;  %v1368_v60 = vsel %vm21_vm0, %v958_v25, 0.0  ;;  %v1567_v43 = vsel %vm21_vm0, %v1478_v9, 0.0 }
 0x12b   :  { %v962_v21 = vld [vmem:[#allocation2 + $0xf0] sm:$0xff]  ;;  %v1367_v27 = vadd.f32 %v1366_v57, %v1365_v24  ;;  %v1565_v2 = vsel %vm21_vm0, %v1477_v37, 0.0  ;;  %v1370_v15 = vsel %vm21_vm0, %v959_v16, 0.0  ;;  %v1569_v25 = vsel %vm21_vm0, %v1479_v34, 0.0  ;;  %v2799_v9 = vld [vmem:[#allocation2 + $0x140] sm:$0xff]  ;;  %v129_v50 = vld [vmem:[#allocation2 + $0x158] sm:$0xff] }
 0x12c   :  { %v1564_v45 = vadd.f32 %v1563_v28, %v1562_v14  ;;  %v1845_v53 = vpack.c.bf16 %v962_v21, %v962_v21  ;;  %v960_v54 = vld [vmem:[#allocation2 + $0xe0] sm:$0xff]  ;;  %v1482_v8 = vmul.f32 %v962_v21, %v962_v21  ;;  %v1376_v26 = vsel %vm21_vm0, %v962_v21, 0.0  ;;  %v127_v57 = vld [vmem:[#allocation2 + $0x148] sm:$0xff] }
 0x12d   :  { %v1843_v4 = vpack.c.bf16 %v960_v54, %v960_v54  ;;  %v1369_v61 = vadd.f32 %v1368_v60, %v1367_v27  ;;  %v1480_v10 = vmul.f32 %v960_v54, %v960_v54  ;;  %v1372_v18 = vsel %vm21_vm0, %v960_v54, 0.0  ;;  %v130_v27 = vld [vmem:[#allocation2 + $0x160] sm:$0xff] }
 0x12e   :  { %v1566_v7 = vadd.f32 %v1565_v2, %v1564_v45  ;;  %1283 = vst.msk [vmem:[%s3233_s2 + $0x78] sm:$0xf] %vm1252_vm3, %v1845_v53  ;;  %v963_v11 = vld [vmem:[#allocation2 + $0xf8] sm:$0xff]  ;;  %v961_v13 = vld [vmem:[#allocation2 + $0xe8] sm:$0xff]  ;;  %v132_v45 = vld [vmem:[#allocation2 + $0x170] sm:$0xff]  ;;  %v1575_v53 = vsel %vm21_vm0, %v1482_v8, 0.0  ;;  %v1855_v60 = vpack.c.bf16 %v2799_v9, %v2799_v9  ;;  %v841_v8 = vadd.f32 %v2482_v5, %v127_v57 }
 0x12f   :  { %1281 = vst.msk [vmem:[%s3233_s2 + $0x70] sm:$0xf] %vm1252_vm3, %v1843_v4  ;;  %v1846_v55 = vpack.c.bf16 %v963_v11, %v963_v11  ;;  %v1371_v24 = vadd.f32 %v1370_v15, %v1369_v61  ;;  %v1844_v14 = vpack.c.bf16 %v961_v13, %v961_v13  ;;  %v1571_v16 = vsel %vm21_vm0, %v1480_v10, 0.0  ;;  %v131_v2 = vld [vmem:[#allocation2 + $0x168] sm:$0xff]  ;;  %v136_v4 = vld [vmem:[#allocation2 + $0x190] sm:$0xff]  ;;  %v137_v15 = vld [vmem:[#allocation2 + $0x198] sm:$0xff] }
 0x130   :  { %v1568_v23 = vadd.f32 %v1567_v43, %v1566_v7  ;;  %v1483_v28 = vmul.f32 %v963_v11, %v963_v11  ;;  %v1374_v34 = vsel %vm21_vm0, %v961_v13, 0.0  ;;  %v1481_v37 = vmul.f32 %v961_v13, %v961_v13  ;;  %v133_v43 = vld [vmem:[#allocation2 + $0x178] sm:$0xff]  ;;  %v134_v13 = vld [vmem:[#allocation2 + $0x180] sm:$0xff]  ;;  %1293 = vst.msk [vmem:[%s3233_s2 + $0xa0] sm:$0xf] %vm1252_vm3, %v1855_v60 }
 0x131   :  { %1284 = vst.msk [vmem:[%s3233_s2 + $0x7c] sm:$0xf] %vm1252_vm3, %v1846_v55  ;;  %v1373_v21 = vadd.f32 %v1372_v18, %v1371_v24  ;;  %1282 = vst.msk [vmem:[%s3233_s2 + $0x74] sm:$0xf] %vm1252_vm3, %v1844_v14  ;;  %v1378_v61 = vsel %vm21_vm0, %v963_v11, 0.0  ;;  %v843_v10 = vadd.f32 %v2476_v0, %v129_v50  ;;  %v844_v11 = vadd.f32 %v2519_v48, %v130_v27  ;;  %v140_v24 = vld [vmem:[#allocation2 + $0x1b0] sm:$0xff] }
 0x132   :  { %v1570_v54 = vadd.f32 %v1569_v25, %v1568_v23  ;;  %v1573_v7 = vsel %vm21_vm0, %v1481_v37, 0.0  ;;  %v135_v25 = vld [vmem:[#allocation2 + $0x188] sm:$0xff]  ;;  %v846_v23 = vadd.f32 %v2508_v40, %v132_v45  ;;  %v138_v14 = vld [vmem:[#allocation2 + $0x1a0] sm:$0xff]  ;;  %v141_v37 = vld [vmem:[#allocation2 + $0x1b8] sm:$0xff]  ;;  %v1577_v0 = vsel %vm21_vm0, %v1483_v28, 0.0  ;;  %906 = vst.msk [vmem:[#allocation2 + $0x148] sm:$0xff] %vm21_vm0, %v841_v8 }
 0x133   :  { %v1375_v55 = vadd.f32 %v1374_v34, %v1373_v21  ;;  %908 = vst.msk [vmem:[#allocation2 + $0x158] sm:$0xff] %vm21_vm0, %v843_v10  ;;  %v847_v5 = vadd.f32 %v2523_v58, %v133_v43  ;;  %v845_v50 = vadd.f32 %v2531_v1, %v131_v2  ;;  %v850_v57 = vadd.f32 %v2556_v29, %v136_v4  ;;  %v144_v34 = vld [vmem:[#allocation2 + $0x1d0] sm:$0xff]  ;;  %v142_v40 = vld [vmem:[#allocation2 + $0x1c0] sm:$0xff]  ;;  %v145_v21 = vld [vmem:[#allocation2 + $0x1d8] sm:$0xff] }
 0x134   :  { %v1572_v18 = vadd.f32 %v1571_v16, %v1570_v54  ;;  %v139_v16 = vld [vmem:[#allocation2 + $0x1a8] sm:$0xff]  ;;  %911 = vst.msk [vmem:[#allocation2 + $0x170] sm:$0xff] %vm21_vm0, %v846_v23  ;;  %909 = vst.msk [vmem:[#allocation2 + $0x160] sm:$0xff] %vm21_vm0, %v844_v11  ;;  %v848_v28 = vadd.f32 %v2565_v38, %v134_v13  ;;  %v851_v27 = vadd.f32 %v2577_v44, %v137_v15  ;;  %v148_v58 = vld [vmem:[#allocation2 + $0x1f0] sm:$0xff]  ;;  %v1386_v11 = vsel %vm21_vm0, %v2441_v35, 0.0 }
 0x135   :  { %v1377_v45 = vadd.f32 %v1376_v26, %v1375_v55  ;;  %v143_v54 = vld [vmem:[#allocation2 + $0x1c8] sm:$0xff]  ;;  %912 = vst.msk [vmem:[#allocation2 + $0x178] sm:$0xff] %vm21_vm0, %v847_v5  ;;  %910 = vst.msk [vmem:[#allocation2 + $0x168] sm:$0xff] %vm21_vm0, %v845_v50  ;;  %v849_v1 = vadd.f32 %v2585_v51, %v135_v25  ;;  %v854_v29 = vadd.f32 %v2614_v20, %v140_v24  ;;  %v146_v38 = vld [vmem:[#allocation2 + $0x1e0] sm:$0xff]  ;;  %v1583_v25 = vsel %vm21_vm0, %v2742_v17, 0.0 }
 0x136   :  { %v1574_v48 = vadd.f32 %v1573_v7, %v1572_v18  ;;  %915 = vst.msk [vmem:[#allocation2 + $0x190] sm:$0xff] %vm21_vm0, %v850_v57  ;;  %v852_v26 = vadd.f32 %v2625_v33, %v138_v14  ;;  %v855_v60 = vadd.f32 %v2630_v41, %v141_v37  ;;  %v149_v43 = vld [vmem:[#allocation2 + $0x1f8] sm:$0xff]  ;;  %913 = vst.msk [vmem:[#allocation2 + $0x180] sm:$0xff] %vm21_vm0, %v848_v28  ;;  %v147_v10 = vld [vmem:[#allocation2 + $0x1e8] sm:$0xff]  ;;  %v1388_v24 = vsel %vm21_vm0, %v2623_v32, 0.0 }
 0x137   :  { %v1379_v2 = vadd.f32 %v1378_v61, %v1377_v45  ;;  %916 = vst.msk [vmem:[#allocation2 + $0x198] sm:$0xff] %vm21_vm0, %v851_v27  ;;  %v853_v4 = vadd.f32 %v2638_v49, %v139_v16  ;;  %v858_v7 = vadd.f32 %v2671_v22, %v144_v34  ;;  %914 = vst.msk [vmem:[#allocation2 + $0x188] sm:$0xff] %vm21_vm0, %v849_v1  ;;  %v1392_v45 = vsel %vm21_vm0, %v2599_v3, 0.0 }
 0x138   :  { %v1576_v44 = vadd.f32 %v1575_v53, %v1574_v48  ;;  %919 = vst.msk [vmem:[#allocation2 + $0x1b0] sm:$0xff] %vm21_vm0, %v854_v29  ;;  %917 = vst.msk [vmem:[#allocation2 + $0x1a0] sm:$0xff] %vm21_vm0, %v852_v26  ;;  %v856_v51 = vadd.f32 %v2677_v31, %v142_v40  ;;  %v859_v20 = vadd.f32 %v2685_v42, %v145_v21  ;;  %v1382_v31 = vsel %vm21_vm0, %v2489_v12, 0.0 }
 0x139   :  { %920 = vst.msk [vmem:[#allocation2 + $0x1b8] sm:$0xff] %vm21_vm0, %v855_v60  ;;  %v857_v33 = vadd.f32 %v2691_v52, %v143_v54  ;;  %v862_v41 = vadd.f32 %v2719_v30, %v148_v58  ;;  %v1381_v49 = vadd.f32 %v2746_v62, %v1379_v2  ;;  %918 = vst.msk [vmem:[#allocation2 + $0x1a8] sm:$0xff] %vm21_vm0, %v853_v4  ;;  %v1384_v52 = vsel %vm21_vm0, %v2415_v19, 0.0  ;;  %v2873_v62 = vld [vmem:[#allocation2 + $0x148] sm:$0xff] }
 0x13a   :  { %v1578_v22 = vadd.f32 %v1577_v0, %v1576_v44  ;;  %923 = vst.msk [vmem:[#allocation2 + $0x1d0] sm:$0xff] %vm21_vm0, %v858_v7  ;;  %v860_v53 = vadd.f32 %v2725_v36, %v146_v38  ;;  %v863_v61 = vadd.f32 %v2734_v59, %v149_v43  ;;  %921 = vst.msk [vmem:[#allocation2 + $0x1c0] sm:$0xff] %vm21_vm0, %v856_v51  ;;  %v2871_v12 = vld [vmem:[#allocation2 + $0x158] sm:$0xff]  ;;  %v1394_v58 = vsel %vm21_vm0, %v2636_v47, 0.0 }
 0x13b   :  { %924 = vst.msk [vmem:[#allocation2 + $0x1d8] sm:$0xff] %vm21_vm0, %v859_v20  ;;  %922 = vst.msk [vmem:[#allocation2 + $0x1c8] sm:$0xff] %vm21_vm0, %v857_v33  ;;  %v861_v42 = vadd.f32 %v2748_v63, %v147_v10  ;;  %v1487_v36 = vmul.f32 %v2441_v35, %v2441_v35  ;;  %v1383_v59 = vadd.f32 %v1382_v31, %v1381_v49  ;;  %v1581_v63 = vsel %vm21_vm0, %v2783_v56, 0.0  ;;  %v2885_v13 = vld [vmem:[#allocation2 + $0x170] sm:$0xff]  ;;  %v2887_v15 = vld [vmem:[#allocation2 + $0x160] sm:$0xff] }
 0x13c   :  { %927 = vst.msk [vmem:[#allocation2 + $0x1f0] sm:$0xff] %vm21_vm0, %v862_v41  ;;  %v1580_v30 = vadd.f32 %v2775_v39, %v1578_v22  ;;  %925 = vst.msk [vmem:[#allocation2 + $0x1e0] sm:$0xff] %vm21_vm0, %v860_v53  ;;  %v1488_v19 = vmul.f32 %v2623_v32, %v2623_v32  ;;  %v1858_v39 = vpack.c.bf16 %v2871_v12, %v2871_v12  ;;  %v2894_v23 = vld [vmem:[#allocation2 + $0x178] sm:$0xff]  ;;  %v2916_v5 = vld [vmem:[#allocation2 + $0x168] sm:$0xff]  ;;  %v1396_v7 = vsel %vm21_vm0, %v2799_v9, 0.0 }
 0x13d   :  { %928 = vst.msk [vmem:[#allocation2 + $0x1f8] sm:$0xff] %vm21_vm0, %v863_v61  ;;  %v1856_v8 = vpack.c.bf16 %v2873_v62, %v2873_v62  ;;  %926 = vst.msk [vmem:[#allocation2 + $0x1e8] sm:$0xff] %vm21_vm0, %v861_v42  ;;  %v1385_v18 = vadd.f32 %v1384_v52, %v1383_v59  ;;  %v1490_v55 = vmul.f32 %v2599_v3, %v2599_v3  ;;  %v1585_v50 = vsel %vm21_vm0, %v1487_v36, 0.0  ;;  %v2928_v40 = vld [vmem:[#allocation2 + $0x190] sm:$0xff]  ;;  %v2937_v21 = vld [vmem:[#allocation2 + $0x180] sm:$0xff] }
 0x13e   :  { %v1582_v56 = vadd.f32 %v1581_v63, %v1580_v30  ;;  %v1491_v14 = vmul.f32 %v2636_v47, %v2636_v47  ;;  %1296 = vst.msk [vmem:[%s3233_s2 + $0xac] sm:$0xf] %vm1252_vm3, %v1858_v39  ;;  %v1861_v17 = vpack.c.bf16 %v2885_v13, %v2885_v13  ;;  %v1489_v32 = vmul.f32 %v2700_v6, %v2700_v6  ;;  %v2939_v54 = vld [vmem:[#allocation2 + $0x188] sm:$0xff]  ;;  %v2952_v26 = vld [vmem:[#allocation2 + $0x198] sm:$0xff] }
 0x13f   :  { %1294 = vst.msk [vmem:[%s3233_s2 + $0xa4] sm:$0xf] %vm1252_vm3, %v1856_v8  ;;  %v1387_v37 = vadd.f32 %v1386_v11, %v1385_v18  ;;  %v1859_v0 = vpack.c.bf16 %v2887_v15, %v2887_v15  ;;  %v1587_v57 = vsel %vm21_vm0, %v1488_v19, 0.0  ;;  %v1492_v16 = vmul.f32 %v2799_v9, %v2799_v9  ;;  %v2954_v60 = vld [vmem:[#allocation2 + $0x1a0] sm:$0xff]  ;;  %v2961_v2 = vld [vmem:[#allocation2 + $0x1b0] sm:$0xff] }
 0x140   :  { %v1584_v35 = vadd.f32 %v1583_v25, %v1582_v56  ;;  %1299 = vst.msk [vmem:[%s3233_s2 + $0xb8] sm:$0xf] %vm1252_vm3, %v1861_v17  ;;  %v1862_v34 = vpack.c.bf16 %v2894_v23, %v2894_v23  ;;  %v1591_v48 = vsel %vm21_vm0, %v1490_v55, 0.0  ;;  %v1593_v1 = vsel %vm21_vm0, %v1491_v14, 0.0  ;;  %v2963_v4 = vld [vmem:[#allocation2 + $0x1b8] sm:$0xff] }
 0x141   :  { %v1389_v28 = vadd.f32 %v1388_v24, %v1387_v37  ;;  %1297 = vst.msk [vmem:[%s3233_s2 + $0xb0] sm:$0xf] %vm1252_vm3, %v1859_v0  ;;  %v1390_v3 = vsel %vm21_vm0, %v2700_v6, 0.0  ;;  %v1860_v29 = vpack.c.bf16 %v2916_v5, %v2916_v5  ;;  %v1589_v47 = vsel %vm21_vm0, %v1489_v32, 0.0  ;;  %v2959_v6 = vld [vmem:[#allocation2 + $0x1a8] sm:$0xff]  ;;  %v2976_v33 = vld [vmem:[#allocation2 + $0x1c0] sm:$0xff] }
 0x142   :  { %v1586_v27 = vadd.f32 %v1585_v50, %v1584_v35  ;;  %1300 = vst.msk [vmem:[%s3233_s2 + $0xbc] sm:$0xf] %vm1252_vm3, %v1862_v34  ;;  %v1865_v44 = vpack.c.bf16 %v2928_v40, %v2928_v40  ;;  %v1595_v10 = vsel %vm21_vm0, %v1492_v16, 0.0  ;;  %v1863_v51 = vpack.c.bf16 %v2937_v21, %v2937_v21  ;;  %v2978_v41 = vld [vmem:[#allocation2 + $0x1c8] sm:$0xff]  ;;  %v2980_v49 = vld [vmem:[#allocation2 + $0x1d0] sm:$0xff]  ;;  %v2988_v61 = vld [vmem:[#allocation2 + $0x1d8] sm:$0xff] }
 0x143   :  { %v1391_v43 = vadd.f32 %v1390_v3, %v1389_v28  ;;  %1298 = vst.msk [vmem:[%s3233_s2 + $0xb4] sm:$0xf] %vm1252_vm3, %v1860_v29  ;;  %v1864_v20 = vpack.c.bf16 %v2939_v54, %v2939_v54  ;;  %v1493_v53 = vmul.f32 %v2873_v62, %v2873_v62  ;;  %v2990_v31 = vld [vmem:[#allocation2 + $0x1e0] sm:$0xff]  ;;  %v1866_v52 = vpack.c.bf16 %v2952_v26, %v2952_v26  ;;  %v3004_v30 = vld [vmem:[#allocation2 + $0x1f0] sm:$0xff] }
 0x144   :  { %v1588_v38 = vadd.f32 %v1587_v57, %v1586_v27  ;;  %1303 = vst.msk [vmem:[%s3233_s2 + $0xc8] sm:$0xf] %vm1252_vm3, %v1865_v44  ;;  %v2992_v42 = vld [vmem:[#allocation2 + $0x1e8] sm:$0xff]  ;;  %1301 = vst.msk [vmem:[%s3233_s2 + $0xc0] sm:$0xf] %vm1252_vm3, %v1863_v51  ;;  %v3006_v36 = vld [vmem:[#allocation2 + $0x1f8] sm:$0xff]  ;;  %v1867_v59 = vpack.c.bf16 %v2954_v60, %v2954_v60  ;;  %v1868_v63 = vpack.c.bf16 %v2959_v6, %v2959_v6 }
 0x145   :  { %v1393_v9 = vadd.f32 %v1392_v45, %v1391_v43  ;;  %1302 = vst.msk [vmem:[%s3233_s2 + $0xc4] sm:$0xf] %vm1252_vm3, %v1864_v20  ;;  %v1869_v19 = vpack.c.bf16 %v2961_v2, %v2961_v2  ;;  %v1870_v39 = vpack.c.bf16 %v2963_v4, %v2963_v4  ;;  %v1871_v18 = vpack.c.bf16 %v2976_v33, %v2976_v33 }
 0x146   :  { %v1590_v22 = vadd.f32 %v1589_v47, %v1588_v38  ;;  %v1872_v56 = vpack.c.bf16 %v2978_v41, %v2978_v41  ;;  %1304 = vst.msk [vmem:[%s3233_s2 + $0xcc] sm:$0xf] %vm1252_vm3, %v1866_v52  ;;  %v1873_v55 = vpack.c.bf16 %v2980_v49, %v2980_v49  ;;  %v1874_v11 = vpack.c.bf16 %v2988_v61, %v2988_v61 }
 0x147   :  { %v1395_v25 = vadd.f32 %v1394_v58, %v1393_v9  ;;  %v1875_v24 = vpack.c.bf16 %v2990_v31, %v2990_v31  ;;  %v1876_v14 = vpack.c.bf16 %v2992_v42, %v2992_v42  ;;  %1305 = vst.msk [vmem:[%s3233_s2 + $0xd0] sm:$0xf] %vm1252_vm3, %v1867_v59  ;;  %1306 = vst.msk [vmem:[%s3233_s2 + $0xd4] sm:$0xf] %vm1252_vm3, %v1868_v63  ;;  %v1398_v50 = vsel %vm21_vm0, %v2873_v62, 0.0 }
 0x148   :  { %v1592_v8 = vadd.f32 %v1591_v48, %v1590_v22  ;;  %1307 = vst.msk [vmem:[%s3233_s2 + $0xd8] sm:$0xf] %vm1252_vm3, %v1869_v19  ;;  %1308 = vst.msk [vmem:[%s3233_s2 + $0xdc] sm:$0xf] %vm1252_vm3, %v1870_v39  ;;  %v1877_v37 = vpack.c.bf16 %v3004_v30, %v3004_v30  ;;  %v1878_v32 = vpack.c.bf16 %v3006_v36, %v3006_v36  ;;  %v1400_v16 = vsel %vm21_vm0, %v2723_v46, 0.0 }
 0x149   :  { %v1397_v17 = vadd.f32 %v1396_v7, %v1395_v25  ;;  %1309 = vst.msk [vmem:[%s3233_s2 + $0xe0] sm:$0xf] %vm1252_vm3, %v1871_v18  ;;  %1310 = vst.msk [vmem:[%s3233_s2 + $0xe4] sm:$0xf] %vm1252_vm3, %v1872_v56  ;;  %v1494_v0 = vmul.f32 %v2723_v46, %v2723_v46  ;;  %v1495_v34 = vmul.f32 %v2871_v12, %v2871_v12  ;;  %v1597_v45 = vsel %vm21_vm0, %v1493_v53, 0.0 }
 0x14a   :  { %v1594_v35 = vadd.f32 %v1593_v1, %v1592_v8  ;;  %1311 = vst.msk [vmem:[%s3233_s2 + $0xe8] sm:$0xf] %vm1252_vm3, %v1873_v55  ;;  %1312 = vst.msk [vmem:[%s3233_s2 + $0xec] sm:$0xf] %vm1252_vm3, %v1874_v11  ;;  %v1496_v48 = vmul.f32 %v2887_v15, %v2887_v15  ;;  %v1402_v1 = vsel %vm21_vm0, %v2871_v12, 0.0  ;;  %v1404_v3 = vsel %vm21_vm0, %v2887_v15, 0.0 }
 0x14b   :  { %1313 = vst.msk [vmem:[%s3233_s2 + $0xf0] sm:$0xf] %vm1252_vm3, %v1875_v24  ;;  %1314 = vst.msk [vmem:[%s3233_s2 + $0xf4] sm:$0xf] %vm1252_vm3, %v1876_v14  ;;  %v1399_v57 = vadd.f32 %v1398_v50, %v1397_v17  ;;  %v1599_v58 = vsel %vm21_vm0, %v1494_v0, 0.0  ;;  %v1601_v38 = vsel %vm21_vm0, %v1495_v34, 0.0  ;;  %v1497_v47 = vmul.f32 %v2916_v5, %v2916_v5 }
 0x14c   :  { %v1596_v62 = vadd.f32 %v1595_v10, %v1594_v35  ;;  %1315 = vst.msk [vmem:[%s3233_s2 + $0xf8] sm:$0xf] %vm1252_vm3, %v1877_v37  ;;  %1316 = vst.msk [vmem:[%s3233_s2 + $0xfc] sm:$0xf] %vm1252_vm3, %v1878_v32  ;;  %v1603_v43 = vsel %vm21_vm0, %v1496_v48, 0.0  ;;  %v1498_v10 = vmul.f32 %v2885_v13, %v2885_v13  ;;  %v1406_v12 = vsel %vm21_vm0, %v2916_v5, 0.0 }
 0x14d   :  { %v1401_v28 = vadd.f32 %v1400_v16, %v1399_v57  ;;  %v1408_v15 = vsel %vm21_vm0, %v2885_v13, 0.0  ;;  %v1499_v9 = vmul.f32 %v2894_v23, %v2894_v23  ;;  %v1605_v22 = vsel %vm21_vm0, %v1497_v47, 0.0  ;;  %s2091_s2 = smov [#allocation3]  }
 0x14e   :  { %v1598_v27 = vadd.f32 %v1597_v45, %v1596_v62  ;;  %v1500_v53 = vmul.f32 %v2937_v21, %v2937_v21  ;;  %v1607_v63 = vsel %vm21_vm0, %v1498_v10, 0.0  ;;  %v1410_v5 = vsel %vm21_vm0, %v2894_v23, 0.0  ;;  %s1658_s23 = sshll.u32 %s2091_s2, 4  ;;  %s1659_s23 = int_to_ptr.vmem [resolvable:$true] %s1658_s23 }
 0x14f   :  { %v1403_v46 = vadd.f32 %v1402_v1, %v1401_v28  ;;  %v1412_v19 = vsel %vm21_vm0, %v2937_v21, 0.0  ;;  %v1609_v8 = vsel %vm21_vm0, %v1499_v9, 0.0  ;;  %v1501_v25 = vmul.f32 %v2939_v54, %v2939_v54  ;;  %s2042_s26 = scalar_lea.vmem %s1659_s23, 16  ;;  %s2046_s27 = scalar_lea.vmem %s1659_s23, 32 }
 0x150   :  { %v1600_v29 = vadd.f32 %v1599_v58, %v1598_v27  ;;  %v1611_v18 = vsel %vm21_vm0, %v1500_v53, 0.0  ;;  %v1414_v11 = vsel %vm21_vm0, %v2939_v54, 0.0  ;;  %v1502_v23 = vmul.f32 %v2928_v40, %v2928_v40  ;;  %p2043_p0 = scmp.ne.s32.totalorder %s1659_s23, %s2042_s26  ;;  %p2047_p1 = scmp.lt.s32.totalorder %s1659_s23, %s1659_s23 }
 0x151   :  { %v1405_v44 = vadd.f32 %v1404_v3, %v1403_v46  ;;  %v1416_v21 = vsel %vm21_vm0, %v2928_v40, 0.0  ;;  %v1503_v17 = vmul.f32 %v2952_v26, %v2952_v26  ;;  %v1504_v35 = vmul.f32 %v2954_v60, %v2954_v60  ;;  %p2048_p2 = scmp.lt.s32.totalorder %s2046_s27, %s2042_s26 }
 0x152   :  { %v1602_v7 = vadd.f32 %v1601_v38, %v1600_v29  ;;  %v1613_v37 = vsel %vm21_vm0, %v1501_v25, 0.0  ;;  %v1418_v54 = vsel %vm21_vm0, %v2952_v26, 0.0  ;;  %v1420_v50 = vsel %vm21_vm0, %v2954_v60, 0.0 }
 0x153   :  { %v1407_v20 = vadd.f32 %v1406_v12, %v1405_v44  ;;  %v1615_v62 = vsel %vm21_vm0, %v1502_v23, 0.0  ;;  %v1505_v16 = vmul.f32 %v2959_v6, %v2959_v6  ;;  %v1617_v34 = vsel %vm21_vm0, %v1503_v17, 0.0  ;;  %p2049_p3 = por %p2048_p2, %p2047_p1 }
 0x154   :  { %v1604_v51 = vadd.f32 %v1603_v43, %v1602_v7  ;;  %v1619_v45 = vsel %vm21_vm0, %v1504_v35, 0.0  ;;  %v1422_v27 = vsel %vm21_vm0, %v2959_v6, 0.0  ;;  %v1506_v26 = vmul.f32 %v2961_v2, %v2961_v2 }
 0x155   :  { %v1409_v59 = vadd.f32 %v1408_v15, %v1407_v20  ;;  %v1424_v1 = vsel %vm21_vm0, %v2961_v2, 0.0  ;;  %v1507_v3 = vmul.f32 %v2963_v4, %v2963_v4  ;;  %v1508_v29 = vmul.f32 %v2976_v33, %v2976_v33  ;;  %p2050_p4 = pnand %p2049_p3, %p2043_p0 }
 0x156   :  { %v1606_v52 = vadd.f32 %v1605_v22, %v1604_v51  ;;  %v1621_v46 = vsel %vm21_vm0, %v1505_v16, 0.0  ;;  %v1426_v6 = vsel %vm21_vm0, %v2963_v4, 0.0  ;;  %v1428_v47 = vsel %vm21_vm0, %v2976_v33, 0.0 }
 0x157   :  { %v1411_v39 = vadd.f32 %v1410_v5, %v1409_v59  ;;  %v1623_v44 = vsel %vm21_vm0, %v1506_v26, 0.0  ;;  %v1509_v10 = vmul.f32 %v2978_v41, %v2978_v41  ;;  %v1625_v12 = vsel %vm21_vm0, %v1507_v3, 0.0 }
 0x158   :  { %v1608_v13 = vadd.f32 %v1607_v63, %v1606_v52  ;;  %v1627_v51 = vsel %vm21_vm0, %v1508_v29, 0.0  ;;  %v1430_v9 = vsel %vm21_vm0, %v2978_v41, 0.0  ;;  %v1510_v4 = vmul.f32 %v2980_v49, %v2980_v49 }
 0x159   :  { %v1413_v56 = vadd.f32 %v1412_v19, %v1411_v39  ;;  %v1432_v53 = vsel %vm21_vm0, %v2980_v49, 0.0  ;;  %v1511_v52 = vmul.f32 %v2988_v61, %v2988_v61  ;;  %v1512_v59 = vmul.f32 %v2990_v31, %v2990_v31 }
 0x15a   :  { %v1610_v55 = vadd.f32 %v1609_v8, %v1608_v13  ;;  %v1629_v63 = vsel %vm21_vm0, %v1509_v10, 0.0  ;;  %v1434_v41 = vsel %vm21_vm0, %v2988_v61, 0.0  ;;  %v1436_v39 = vsel %vm21_vm0, %v2990_v31, 0.0 }
 0x15b   :  { %v1415_v24 = vadd.f32 %v1414_v11, %v1413_v56  ;;  %v1631_v13 = vsel %vm21_vm0, %v1510_v4, 0.0  ;;  %v1513_v25 = vmul.f32 %v2992_v42, %v2992_v42  ;;  %v1635_v56 = vsel %vm21_vm0, %v1512_v59, 0.0 }
 0x15c   :  { %v1612_v14 = vadd.f32 %v1611_v18, %v1610_v55  ;;  %v1633_v18 = vsel %vm21_vm0, %v1511_v52, 0.0  ;;  %v1438_v23 = vsel %vm21_vm0, %v2992_v42, 0.0  ;;  %v1514_v61 = vmul.f32 %v3004_v30, %v3004_v30 }
 0x15d   :  { %v1417_v32 = vadd.f32 %v1416_v21, %v1415_v24  ;;  %v1515_v21 = vmul.f32 %v3006_v36, %v3006_v36  ;;  %v1637_v17 = vsel %vm21_vm0, %v1513_v25, 0.0 }
 0x15e   :  { %v1614_v0 = vadd.f32 %v1613_v37, %v1612_v14  ;;  %v1440_v14 = vsel %vm21_vm0, %v3004_v30, 0.0  ;;  %v1639_v42 = vsel %vm21_vm0, %v1514_v61, 0.0 }
 0x15f   :  { %v1419_v57 = vadd.f32 %v1418_v54, %v1417_v32  ;;  %v1442_v32 = vsel %vm21_vm0, %v3006_v36, 0.0 }
 0x160   :  { %v1616_v40 = vadd.f32 %v1615_v62, %v1614_v0 }
 0x161   :  { %v1421_v48 = vadd.f32 %v1420_v50, %v1419_v57  ;;  %v1641_v50 = vsel %vm21_vm0, %v1515_v21, 0.0 }
 0x162   :  { %v1618_v28 = vadd.f32 %v1617_v34, %v1616_v40 }
 0x163   :  { %v1423_v60 = vadd.f32 %v1422_v27, %v1421_v48 }
 0x164   :  { %v1620_v58 = vadd.f32 %v1619_v45, %v1618_v28 }
 0x165   :  { %v1425_v38 = vadd.f32 %v1424_v1, %v1423_v60 }
 0x166   :  { %v1622_v43 = vadd.f32 %v1621_v46, %v1620_v58 }
 0x167   :  { %v1427_v7 = vadd.f32 %v1426_v6, %v1425_v38 }
 0x168   :  { %v1624_v2 = vadd.f32 %v1623_v44, %v1622_v43 }
 0x169   :  { %v1429_v20 = vadd.f32 %v1428_v47, %v1427_v7 }
 0x16a   :  { %v1626_v15 = vadd.f32 %v1625_v12, %v1624_v2 }
 0x16b   :  { %v1431_v33 = vadd.f32 %v1430_v9, %v1429_v20 }
 0x16c   :  { %v1628_v22 = vadd.f32 %v1627_v51, %v1626_v15 }
 0x16d   :  { %v1433_v5 = vadd.f32 %v1432_v53, %v1431_v33 }
 0x16e   :  { %v1630_v19 = vadd.f32 %v1629_v63, %v1628_v22 }
 0x16f   :  { %v1435_v8 = vadd.f32 %v1434_v41, %v1433_v5 }
 0x170   :  { %v1632_v49 = vadd.f32 %v1631_v13, %v1630_v19 }
 0x171   :  { %v1437_v55 = vadd.f32 %v1436_v39, %v1435_v8 }
 0x172   :  { %v1634_v11 = vadd.f32 %v1633_v18, %v1632_v49 }
 0x173   :  { %v1439_v31 = vadd.f32 %v1438_v23, %v1437_v55 }
 0x174   :  { %v1636_v24 = vadd.f32 %v1635_v56, %v1634_v11 }
 0x175   :  { %v1441_v35 = vadd.f32 %v1440_v14, %v1439_v31 }
 0x176   :  { %v1638_v37 = vadd.f32 %v1637_v17, %v1636_v24 }
 0x177   :  { %v1443_v0 = vadd.f32 %v1442_v32, %v1441_v35 }
 0x178   :  { %v1640_v54 = vadd.f32 %v1639_v42, %v1638_v37 }
 0x179   :  { %v1444_v62 = vrot.slane %v1443_v0, 4 }
 0x17a   :  { %v1642_v57 = vadd.f32 %v1641_v50, %v1640_v54 }
 0x17b   :  { %v1445_v40 = vadd.f32 %v1444_v62, %v1443_v0 }
 0x17c   :  { %v1643_v30 = vrot.slane %v1642_v57, 4 }
 0x17d   :  { %v1446_v16 = vrot.slane %v1445_v40, 2 }
 0x17e   :  { %v1644_v34 = vadd.f32 %v1643_v30, %v1642_v57 }
 0x17f   :  { %v1447_v45 = vadd.f32 %v1446_v16, %v1445_v40 }
 0x180   :  { %v1645_v48 = vrot.slane %v1644_v34, 2 }
 0x181   :  { %v1448_v28 = vrot.slane %v1447_v45, 1 }
 0x182   :  { %v1646_v27 = vadd.f32 %v1645_v48, %v1644_v34 }
 0x183   :  { %v1449_v36 = vadd.f32 %v1448_v28, %v1447_v45 }
 0x184   :  { %v1647_v26 = vrot.slane %v1646_v27, 1 }
 0x185   :  { %1451 = vst.msk [vmem:[#allocation3] sm:$0x1] %vm1450_vm4, %v1449_v36 }
 0x186   :  { %v1648_v60 = vadd.f32 %v1647_v26, %v1646_v27 }
 0x187   :  { %2053 = shalt.err (!%p2050_p4)
}
 0x188   :  { %s2054_s30 = scalar_lea.hbm %s3234_s3, 16 }
 0x189   :  { %p2055_p5 = scmp.ne.s32.totalorder %s3234_s3, %s2054_s30  ;;  %p2058_p6 = scmp.lt.u32.totalorder %s2054_s30, %s3234_s3 }
 0x18b   :  { %p2060_p7 = pnand %p2058_p6, %p2055_p5 }
 0x18d   :  { %2063 = shalt.err (!%p2060_p7)
}
 0x18e   :  { %1661 = dma.vmem_to_hbm [thread:$0]  %s1659_s23, 16, %s3234_s3, [#allocation4]   ;;  %1649 = vst.msk [vmem:[#allocation5] sm:$0x1] %vm1450_vm4, %v1648_v60 }
 0x18f   :  { %s2064_s9 = scalar_lea.vmem %s3198_s25, 16  ;;  %s2068_s10 = scalar_lea.vmem %s3198_s25, 32 }
 0x190   :  { %p2065_p8 = scmp.ne.s32.totalorder %s3198_s25, %s2064_s9  ;;  %p2069_p9 = scmp.lt.s32.totalorder %s3198_s25, %s3198_s25 }
 0x191   :  { %p2070_p10 = scmp.lt.s32.totalorder %s2068_s10, %s2064_s9 }
 0x193   :  { %p2071_p11 = por %p2070_p10, %p2069_p9 }
 0x195   :  { %p2072_p12 = pnand %p2071_p11, %p2065_p8 }
 0x197   :  { %2075 = shalt.err (!%p2072_p12)
}
 0x198   :  { %s2076_s13 = scalar_lea.hbm %s3235_s4, 16 }
 0x199   :  { %p2077_p13 = scmp.ne.s32.totalorder %s3235_s4, %s2076_s13  ;;  %p2080_p0 = scmp.lt.u32.totalorder %s2076_s13, %s3235_s4 }
 0x19b   :  { %p2082_p1 = pnand %p2080_p0, %p2077_p13 }
 0x19d   :  { %2085 = shalt.err (!%p2082_p1)
}
 0x19e   :  { %1671 = dma.vmem_to_hbm [thread:$0]  %s3198_s25, 16, %s3235_s4, [#allocation6]  }
 0x19f   :  { %2086 = dma.done.wait [#allocation4], 16  }
 0x1a0   :  { %2087 = vsyncadd [#allocation4], 4294967280 }
 0x1a1   :  { %2088 = dma.done.wait [#allocation6], 16  }
 0x1a2   :  { %2089 = vsyncadd [#allocation6], 4294967280 }
 0x1a3   :  { %1680 = vsyncpa [#allocation4], 1 }
 0x1a4   :  { %1681 = vsyncpa [#allocation6], 1 }

</bundles_post_ra>
